<compile_context>
chip_gen: v6e
topology: v6e:2x2x1
jax: 0.10.0
libtpu: 0.0.40
codegen_flags: <defaults>
</compile_context>

<pallas_src>
import numpy as np
import jax
import jax.numpy as jnp
from jax.experimental import pallas as pl
from jax.experimental.pallas import tpu as pltpu

EMB = 20            # embedding width (nn.Embedding(vocab, 20))
RAW_F = 27          # dense features per item (6 locale + 21 price)
D = EMB + RAW_F     # 47 == input_dim
D2 = 2 * D          # 94 (attention output ++ next-item features)
H1 = D              # 47
H2 = D // 2         # 23
H3 = D // 4         # 11

SEGS = [(0, 20), (20, 26), (26, 47), (47, 67), (67, 73), (73, 94)]


def _relu(x):
    return jnp.maximum(x, 0.0)


# ---------------------------------------------------------------------------
# Parameter packing: one bf16 weight slab + one f32 bias slab.
# Each weight sits in its own 128-lane-aligned column block starting at row 0.
# ---------------------------------------------------------------------------
def _pack_params(p, out_pad):
    np_p = {k: np.asarray(v, np.float32) for k, v in p.items()}
    out_dim = np_p["fc4_w"].shape[1]

    seg_mean = np.zeros((D2, 6), np.float32)
    seg_sel = np.zeros((6, D2), np.float32)
    for j, (a, b) in enumerate(SEGS):
        seg_mean[a:b, j] = 1.0 / (b - a)
        seg_sel[j, a:b] = 1.0

    # Fold the (linear) group-mean reduction into the SE fc1 weight.
    se1_w_fold = seg_mean @ np_p["se1_w"]                       # (94, 2)

    fc4_w = np.zeros((H3, out_pad), np.float32)
    fc4_w[:, :out_dim] = np_p["fc4_w"]
    fc4_b = np.full((out_pad,), -1e30, np.float32)              # pad logits -> 0 after softmax
    fc4_b[:out_dim] = np_p["fc4_b"]

    # (name, weight, bias-or-None, column-block width).  q/k/v MUST stay the
    # first three blocks (contiguous 0/128/256 offsets for the fused matmul).
    blocks = [
        ("q",       np_p["wq_w"],    np_p["wq_b"],    128),
        ("k",       np_p["wk_w"],    np_p["wk_b"],    128),
        ("v",       np_p["wv_w"],    np_p["wv_b"],    128),
        ("se1",     se1_w_fold,      np_p["se1_b"],   128),
        ("se2",     np_p["se2_w"],   np_p["se2_b"],   128),
        ("seg_sel", seg_sel,         None,            128),
        ("fc1",     np_p["fc1_w"],   np_p["fc1_b"],   128),
        ("fc1_2",   np_p["fc1_2_w"], np_p["fc1_2_b"], 128),
        ("fc2",     np_p["fc2_w"],   np_p["fc2_b"],   128),
        ("fc2_2",   np_p["fc2_2_w"], np_p["fc2_2_b"], 128),
        ("fc3",     np_p["fc3_w"],   np_p["fc3_b"],   128),
        ("fc3_2",   np_p["fc3_2_w"], np_p["fc3_2_b"], 128),
        ("fc4",     fc4_w,           fc4_b,           out_pad),
    ]

    rows_max = max(w.shape[0] for _, w, _, _ in blocks)
    slab_rows = ((rows_max + 15) // 16) * 16                    # bf16 sublane tile
    total_cols = sum(width for *_, width in blocks)

    w_slab = np.zeros((slab_rows, total_cols), np.float32)
    b_slab = np.zeros((1, total_cols), np.float32)
    layout = {}
    off = 0
    for name, w, b, width in blocks:
        r, c = w.shape
        w_slab[:r, off:off + c] = w
        if b is not None:
            b_slab[0, off:off + b.shape[0]] = b
        layout[name] = (r, off, c)
        off += width

    return (jnp.asarray(w_slab, jnp.bfloat16),
            jnp.asarray(b_slab, jnp.float32),
            layout)


# ---------------------------------------------------------------------------
# Kernel
# ---------------------------------------------------------------------------
def _make_kernel(layout, out_pad):
    assert layout["q"][1] == 0 and layout["k"][1] == 128 and layout["v"][1] == 256
    k_off = layout["k"][1]
    v_off = layout["v"][1]
    qkv_cols = v_off + 128                                      # 384

    def kernel(x_ref, mask_ref, w_ref, b_ref, out_ref):
        x = x_ref[...]                                          # (TB, S, D) f32
        TB, S, Dx = x.shape
        mask = mask_ref[...]                                    # (TB, S) int32

        # ---- AttentionLayerWithMask (single query at position seq_len-1) ----
        seqlen = jnp.sum(mask, axis=1, keepdims=True)           # (TB, 1)
        pos = jax.lax.broadcasted_iota(jnp.int32, (TB, S), 1)
        sel_q = (pos == (seqlen - 1)).astype(jnp.float32)       # query one-hot
        valid = pos < (seqlen - 1)                              # keys 0 .. L-2

        # Fused Q/K/V projection: one MXU pass (bf16 operands, f32 accumulate).
        wqkv = w_ref[0:Dx, 0:qkv_cols]                          # (47, 384) bf16
        bqkv = b_ref[0:1, 0:qkv_cols]                           # (1, 384) f32
        x2d = x.reshape(TB * S, Dx).astype(jnp.bfloat16)
        qkv = (jnp.dot(x2d, wqkv, preferred_element_type=jnp.float32)
               + bqkv).reshape(TB, S, qkv_cols)
        q_all = qkv[:, :, 0:Dx]                                 # (TB, S, D)
        k = qkv[:, :, k_off:k_off + Dx]
        v = qkv[:, :, v_off:v_off + Dx]

        # Attention contractions on VPU/XLU (M=1 batched matmuls would waste
        # whole MXU passes per batch element).
        q = jnp.sum(q_all * sel_q[:, :, None], axis=1)          # (TB, D)
        scores = jnp.sum(q[:, None, :] * k, axis=-1)            # (TB, S) f32
        scores = jnp.where(valid, scores, -1e30)
        m = jnp.max(scores, axis=1, keepdims=True)
        p = jnp.where(valid, jnp.exp(scores - m), 0.0)
        denom = jnp.sum(p, axis=1, keepdims=True)
        inv = jnp.where(denom > 0.0, pl.reciprocal(denom, approx=True), 0.0)
        attn = p * inv                                          # (TB, S)
        ctx = jnp.sum(attn[:, :, None] * v, axis=1)             # (TB, D)
        prev = jnp.tanh(ctx)
        # TODO(synk): nn.Dropout(p=0.5) layers run in eval mode (identity), no RNG applied.

        nxt = x[:, S - 1, :]                                    # (TB, D) last position
        cat = jnp.concatenate([prev, nxt], axis=1)              # (TB, 94)

        def lin(h, name):
            r, off, c = layout[name]
            w = w_ref[0:r, off:off + c]                         # bf16
            b = b_ref[0:1, off:off + c]                         # f32
            return jnp.dot(h.astype(jnp.bfloat16), w,
                           preferred_element_type=jnp.float32) + b

        # ---- SENet (group-mean matrix folded into the SE fc1 weight) ----
        se_h = _relu(lin(cat, "se1"))                           # (TB, 2)
        w6 = jax.nn.sigmoid(lin(se_h, "se2"))                   # (TB, 6)
        scale = lin(w6, "seg_sel")                              # (TB, 94), zero bias
        se_out = cat * scale

        # ---- MLP head ----
        h = _relu(lin(se_out, "fc1"))
        h = _relu(lin(h, "fc1_2"))
        h = _relu(lin(h, "fc2"))
        h = _relu(lin(h, "fc2_2"))
        h = _relu(lin(h, "fc3"))
        h = _relu(lin(h, "fc3_2"))
        logits = lin(h, "fc4")                                  # (TB, out_pad); pad bias = -1e30

        z = logits - jnp.max(logits, axis=1, keepdims=True)
        e = jnp.exp(z)
        # Exact divide for the output normalization (rows sum to 1).
        out_ref[...] = e / jnp.sum(e, axis=1, keepdims=True)

    return kernel


# ---------------------------------------------------------------------------
# Wrapper
# ---------------------------------------------------------------------------
def model_forward(x_raw, mask, params, *, batch_tile=None):
    """x_raw: (B, S, 28) float32 (col 0 = item id), mask: (B, S)."""
    B, S, _ = x_raw.shape
    ids = x_raw[:, :, 0].astype(jnp.int32)
    feats = x_raw[:, :, 1:].astype(jnp.float32)

    # Embedding lookup stays a plain XLA row-gather (table never enters VMEM).
    emb = jnp.take(params["embed"], ids, axis=0)                # (B, S, EMB)
    x = jnp.concatenate([emb, feats], axis=-1)                  # (B, S, D)
    mask_i = mask.astype(jnp.int32)

    out_dim = params["fc4_w"].shape[1]
    out_pad = max(128, pl.cdiv(out_dim, 128) * 128)             # lane-dense store
    w_slab, b_slab, layout = _pack_params(params, out_pad)

    if batch_tile is None:
        # Single grid step when the whole batch fits (v6e/v5e: one TC, 128 MiB
        # VMEM).  On v7x pass batch_tile=B//2 so both TensorCores get work.
        batch_tile = B if B <= 256 else 256
    tb = batch_tile
    assert B % tb == 0 and tb % 8 == 0, "batch tile must divide B and be a multiple of 8"

    kernel = _make_kernel(layout, out_pad)

    out = pl.pallas_call(
        kernel,
        out_shape=jax.ShapeDtypeStruct((B, out_pad), jnp.float32),
        grid=(B // tb,),
        in_specs=[
            pl.BlockSpec((tb, S, D), lambda i: (i, 0, 0)),
            pl.BlockSpec((tb, S), lambda i: (i, 0)),
            pl.BlockSpec(w_slab.shape, lambda i: (0, 0)),       # broadcast weight slab
            pl.BlockSpec(b_slab.shape, lambda i: (0, 0)),       # broadcast bias slab
        ],
        out_specs=pl.BlockSpec((tb, out_pad), lambda i: (i, 0)),
        compiler_params=pltpu.CompilerParams(
            dimension_semantics=("parallel",)),
    )(x, mask_i, w_slab, b_slab)
    return out[:, :out_dim]


def init_params(key, vocab_size, out_dim):
    names_shapes = [
        ("embed", (vocab_size, EMB)),
        ("wq_w", (D, D)), ("wq_b", (D,)),
        ("wk_w", (D, D)), ("wk_b", (D,)),
        ("wv_w", (D, D)), ("wv_b", (D,)),
        ("se1_w", (6, 2)), ("se1_b", (2,)),
        ("se2_w", (2, 6)), ("se2_b", (6,)),
        ("fc1_w", (D2, H1)), ("fc1_b", (H1,)),
        ("fc1_2_w", (H1, H1)), ("fc1_2_b", (H1,)),
        ("fc2_w", (H1, H2)), ("fc2_b", (H2,)),
        ("fc2_2_w", (H2, H2)), ("fc2_2_b", (H2,)),
        ("fc3_w", (H2, H3)), ("fc3_b", (H3,)),
        ("fc3_2_w", (H3, H3)), ("fc3_2_b", (H3,)),
        ("fc4_w", (H3, out_dim)), ("fc4_b", (out_dim,)),
    ]
    keys = jax.random.split(key, len(names_shapes))
    params = {}
    for (name, shape), k in zip(names_shapes, keys):
        if name.endswith("_b"):
            params[name] = jax.random.uniform(k, shape, jnp.float32, -0.1, 0.1)
        else:
            scale = 1.0 / np.sqrt(shape[0])
            params[name] = jax.random.normal(k, shape, jnp.float32) * scale
    return params


def reference_forward(x_raw, mask, p):
    """Pure numpy transliteration of the PyTorch forward (eval mode)."""
    ids = x_raw[:, :, 0].astype(np.int64)
    emb = p["embed"][ids]
    x = np.concatenate([emb, x_raw[:, :, 1:]], axis=2).astype(np.float32)
    B, S, _ = x.shape
    seq_len = mask.sum(axis=1).astype(np.int32)
    prev = np.zeros((B, D), np.float32)
    for i in range(B):
        L = int(seq_len[i])
        q = x[i, L - 1:L, :] @ p["wq_w"] + p["wq_b"]
        k = x[i, :L - 1, :] @ p["wk_w"] + p["wk_b"]
        v = x[i, :L - 1, :] @ p["wv_w"] + p["wv_b"]
        if L > 1:
            s = q @ k.T
            s = s - s.max(axis=1, keepdims=True)
            a = np.exp(s)
            a /= a.sum(axis=1, keepdims=True)
            prev[i] = (a @ v)[0]
    prev = np.tanh(prev)
    nxt = x[:, -1, :]
    cat = np.concatenate([prev, nxt], axis=1)                        # (B, 94)
    means = np.stack([cat[:, a:b].mean(axis=1) for a, b in SEGS], axis=1)
    h = np.maximum(means @ p["se1_w"] + p["se1_b"], 0.0)
    w6 = 1.0 / (1.0 + np.exp(-(h @ p["se2_w"] + p["se2_b"])))
    se_out = np.concatenate(
        [w6[:, j:j + 1] * cat[:, a:b] for j, (a, b) in enumerate(SEGS)], axis=1)

    def lin(z, wn, bn):
        return z @ p[wn] + p[bn]

    h = np.maximum(lin(se_out, "fc1_w", "fc1_b"), 0.0)
    h = np.maximum(lin(h, "fc1_2_w", "fc1_2_b"), 0.0)
    h = np.maximum(lin(h, "fc2_w", "fc2_b"), 0.0)
    h = np.maximum(lin(h, "fc2_2_w", "fc2_2_b"), 0.0)
    h = np.maximum(lin(h, "fc3_w", "fc3_b"), 0.0)
    h = np.maximum(lin(h, "fc3_2_w", "fc3_2_b"), 0.0)
    logits = lin(h, "fc4_w", "fc4_b")
    z = logits - logits.max(axis=1, keepdims=True)
    e = np.exp(z)
    return e / e.sum(axis=1, keepdims=True)


if __name__ == "__main__":
    B, S, VOCAB, OUT = 16, 8, 32, 16

    key = jax.random.PRNGKey(0)
    k_id, k_feat, k_param = jax.random.split(key, 3)

    ids = jax.random.randint(k_id, (B, S), 0, VOCAB)
    dense = jax.random.normal(k_feat, (B, S, RAW_F), jnp.float32)
    x_raw = jnp.concatenate([ids[:, :, None].astype(jnp.float32), dense], axis=2)
    seq_lens = (jnp.arange(B, dtype=jnp.int32) % (S - 1)) + 2        # lengths in [2, S]
    mask = (jnp.arange(S)[None, :] < seq_lens[:, None]).astype(jnp.float32)

    params = init_params(k_param, VOCAB, OUT)

    out = model_forward(x_raw, mask, params)                         # single grid step
    out = jax.block_until_ready(out)
    out_np = np.asarray(out)

    ref = reference_forward(np.asarray(x_raw), np.asarray(mask),
                            {k: np.asarray(v) for k, v in params.items()})
    np.testing.assert_allclose(out_np, ref, atol=2e-2, rtol=2e-2)
    assert np.all(np.isfinite(out_np))
    assert np.allclose(out_np.sum(axis=1), 1.0, atol=1e-3)           # exact divide in output softmax

    print("KERNEL_OK")
</pallas_src>

<mosaic_0001>
module attributes {stable_mosaic.version = 11 : i64} {
  func.func @kernel(%arg0: i32, %arg1: memref<16x8x47xf32, #tpu.memory_space<vmem>>, %arg2: memref<16x8xi32, #tpu.memory_space<vmem>>, %arg3: memref<96x1664xbf16, #tpu.memory_space<vmem>>, %arg4: memref<1x1664xf32, #tpu.memory_space<vmem>>, %arg5: memref<16x128xf32, #tpu.memory_space<vmem>>) attributes {dimension_semantics = [#tpu.dimension_semantics<parallel>], iteration_bounds = array<i64: 1>, scalar_prefetch = 0 : i64, scratch_operands = 0 : i64, tpu.core_type = #tpu.core_type<tc>, window_params = [{transform_indices = @transform_0, window_bounds = array<i64: 16, 8, 47>}, {transform_indices = @transform_1, window_bounds = array<i64: 16, 8>}, {pipeline_mode = #tpu.pipeline_mode<synchronous>, transform_indices = @transform_2, window_bounds = array<i64: 96, 1664>}, {pipeline_mode = #tpu.pipeline_mode<synchronous>, transform_indices = @transform_3, window_bounds = array<i64: 1, 1664>}, {transform_indices = @transform_4, window_bounds = array<i64: 16, 128>}]} {
    %c0 = arith.constant 0 : index
    %c0_0 = arith.constant 0 : index
    %c0_1 = arith.constant 0 : index
    %0 = vector.load %arg1[%c0, %c0_0, %c0_1] : memref<16x8x47xf32, #tpu.memory_space<vmem>>, vector<16x8x47xf32>
    %c0_2 = arith.constant 0 : index
    %c0_3 = arith.constant 0 : index
    %1 = vector.load %arg2[%c0_2, %c0_3] : memref<16x8xi32, #tpu.memory_space<vmem>>, vector<16x8xi32>
    %cst = arith.constant dense<0> : vector<16xi32>
    %2 = vector.multi_reduction <add>, %1, %cst [1] : vector<16x8xi32> to vector<16xi32>
    %3 = vector.shape_cast %2 : vector<16xi32> to vector<16x1xi32>
    %4 = tpu.iota {dimensions = array<i32: 1>} : vector<16x8xi32>
    %c1_i32 = arith.constant 1 : i32
    %5 = vector.broadcast %c1_i32 : i32 to vector<16x1xi32>
    %6 = arith.subi %3, %5 : vector<16x1xi32>
    %7 = vector.broadcast %6 : vector<16x1xi32> to vector<16x8xi32>
    %8 = arith.cmpi eq, %4, %7 : vector<16x8xi32>
    %9 = arith.extui %8 : vector<16x8xi1> to vector<16x8xi32>
    %10 = arith.sitofp %9 : vector<16x8xi32> to vector<16x8xf32>
    %c1_i32_4 = arith.constant 1 : i32
    %11 = vector.broadcast %c1_i32_4 : i32 to vector<16x1xi32>
    %12 = arith.subi %3, %11 : vector<16x1xi32>
    %13 = vector.broadcast %12 : vector<16x1xi32> to vector<16x8xi32>
    %14 = arith.cmpi slt, %4, %13 : vector<16x8xi32>
    %c0_5 = arith.constant 0 : index
    %c0_6 = arith.constant 0 : index
    %15 = vector.load %arg3[%c0_5, %c0_6] : memref<96x1664xbf16, #tpu.memory_space<vmem>>, vector<47x384xbf16>
    %c0_7 = arith.constant 0 : index
    %c0_8 = arith.constant 0 : index
    %16 = vector.load %arg4[%c0_7, %c0_8] : memref<1x1664xf32, #tpu.memory_space<vmem>>, vector<1x384xf32>
    %17 = vector.shape_cast %0 : vector<16x8x47xf32> to vector<128x47xf32>
    %18 = arith.truncf %17 : vector<128x47xf32> to vector<128x47xbf16>
    %cst_9 = arith.constant dense<0.000000e+00> : vector<128x384xf32>
    %19 = tpu.matmul %18, %15, %cst_9 {dimension_numbers = #tpu.dot_dimension_numbers<[1], [0], [0], [1], [0, 0, 1, 1], [], []>} : vector<128x47xbf16>, vector<47x384xbf16>, vector<128x384xf32> -> vector<128x384xf32>
    %20 = vector.broadcast %16 : vector<1x384xf32> to vector<128x384xf32>
    %21 = arith.addf %19, %20 : vector<128x384xf32>
    %22 = vector.shape_cast %21 : vector<128x384xf32> to vector<16x8x384xf32>
    %23 = vector.extract_strided_slice %22 {offsets = [0, 0, 0], sizes = [16, 8, 47], strides = [1, 1, 1]} : vector<16x8x384xf32> to vector<16x8x47xf32>
    %24 = vector.extract_strided_slice %22 {offsets = [0, 0, 128], sizes = [16, 8, 47], strides = [1, 1, 1]} : vector<16x8x384xf32> to vector<16x8x47xf32>
    %25 = vector.extract_strided_slice %22 {offsets = [0, 0, 256], sizes = [16, 8, 47], strides = [1, 1, 1]} : vector<16x8x384xf32> to vector<16x8x47xf32>
    %26 = vector.shape_cast %10 : vector<16x8xf32> to vector<16x8x1xf32>
    %27 = vector.broadcast %26 : vector<16x8x1xf32> to vector<16x8x47xf32>
    %28 = arith.mulf %23, %27 : vector<16x8x47xf32>
    %cst_10 = arith.constant dense<0.000000e+00> : vector<16x47xf32>
    %29 = vector.multi_reduction <add>, %28, %cst_10 [1] : vector<16x8x47xf32> to vector<16x47xf32>
    %30 = vector.shape_cast %29 : vector<16x47xf32> to vector<16x1x47xf32>
    %31 = vector.broadcast %30 : vector<16x1x47xf32> to vector<16x8x47xf32>
    %32 = arith.mulf %31, %24 : vector<16x8x47xf32>
    %cst_11 = arith.constant dense<0.000000e+00> : vector<16x8xf32>
    %33 = vector.multi_reduction <add>, %32, %cst_11 [2] : vector<16x8x47xf32> to vector<16x8xf32>
    %cst_12 = arith.constant -1.000000e+30 : f32
    %34 = vector.broadcast %cst_12 : f32 to vector<16x8xf32>
    %35 = arith.select %14, %33, %34 : vector<16x8xi1>, vector<16x8xf32>
    %cst_13 = arith.constant dense<0xFF800000> : vector<16xf32>
    %36 = vector.multi_reduction <maximumf>, %35, %cst_13 [1] : vector<16x8xf32> to vector<16xf32>
    %37 = vector.shape_cast %36 : vector<16xf32> to vector<16x1xf32>
    %38 = vector.broadcast %37 : vector<16x1xf32> to vector<16x8xf32>
    %39 = arith.subf %35, %38 : vector<16x8xf32>
    %40 = math.exp %39 : vector<16x8xf32>
    %cst_14 = arith.constant 0.000000e+00 : f32
    %41 = vector.broadcast %cst_14 : f32 to vector<16x8xf32>
    %42 = arith.select %14, %40, %41 : vector<16x8xi1>, vector<16x8xf32>
    %cst_15 = arith.constant dense<0.000000e+00> : vector<16xf32>
    %43 = vector.multi_reduction <add>, %42, %cst_15 [1] : vector<16x8xf32> to vector<16xf32>
    %44 = vector.shape_cast %43 : vector<16xf32> to vector<16x1xf32>
    %cst_16 = arith.constant 0.000000e+00 : f32
    %45 = vector.broadcast %cst_16 : f32 to vector<16x1xf32>
    %46 = arith.cmpf ogt, %44, %45 : vector<16x1xf32>
    %47 = tpu.reciprocal %44 {approx = true} : vector<16x1xf32> -> vector<16x1xf32>
    %cst_17 = arith.constant 0.000000e+00 : f32
    %48 = vector.broadcast %cst_17 : f32 to vector<16x1xf32>
    %49 = arith.select %46, %47, %48 : vector<16x1xi1>, vector<16x1xf32>
    %50 = vector.broadcast %49 : vector<16x1xf32> to vector<16x8xf32>
    %51 = arith.mulf %42, %50 : vector<16x8xf32>
    %52 = vector.shape_cast %51 : vector<16x8xf32> to vector<16x8x1xf32>
    %53 = vector.broadcast %52 : vector<16x8x1xf32> to vector<16x8x47xf32>
    %54 = arith.mulf %53, %25 : vector<16x8x47xf32>
    %cst_18 = arith.constant dense<0.000000e+00> : vector<16x47xf32>
    %55 = vector.multi_reduction <add>, %54, %cst_18 [1] : vector<16x8x47xf32> to vector<16x47xf32>
    %56 = math.tanh %55 : vector<16x47xf32>
    %57 = vector.extract_strided_slice %0 {offsets = [0, 7, 0], sizes = [16, 1, 47], strides = [1, 1, 1]} : vector<16x8x47xf32> to vector<16x1x47xf32>
    %58 = vector.shape_cast %57 : vector<16x1x47xf32> to vector<16x47xf32>
    %59 = tpu.concatenate %56, %58 in 1 : vector<16x47xf32>, vector<16x47xf32> -> vector<16x94xf32>
    %c0_19 = arith.constant 0 : index
    %c384 = arith.constant 384 : index
    %60 = vector.load %arg3[%c0_19, %c384] : memref<96x1664xbf16, #tpu.memory_space<vmem>>, vector<94x2xbf16>
    %c0_20 = arith.constant 0 : index
    %c384_21 = arith.constant 384 : index
    %61 = vector.load %arg4[%c0_20, %c384_21] : memref<1x1664xf32, #tpu.memory_space<vmem>>, vector<1x2xf32>
    %62 = arith.truncf %59 : vector<16x94xf32> to vector<16x94xbf16>
    %cst_22 = arith.constant dense<0.000000e+00> : vector<16x2xf32>
    %63 = tpu.matmul %62, %60, %cst_22 {dimension_numbers = #tpu.dot_dimension_numbers<[1], [0], [0], [1], [0, 0, 1, 1], [], []>} : vector<16x94xbf16>, vector<94x2xbf16>, vector<16x2xf32> -> vector<16x2xf32>
    %64 = vector.broadcast %61 : vector<1x2xf32> to vector<16x2xf32>
    %65 = arith.addf %63, %64 : vector<16x2xf32>
    %cst_23 = arith.constant 0.000000e+00 : f32
    %66 = vector.broadcast %cst_23 : f32 to vector<16x2xf32>
    %67 = arith.maximumf %65, %66 : vector<16x2xf32>
    %c0_24 = arith.constant 0 : index
    %c512 = arith.constant 512 : index
    %68 = vector.load %arg3[%c0_24, %c512] : memref<96x1664xbf16, #tpu.memory_space<vmem>>, vector<2x6xbf16>
    %c0_25 = arith.constant 0 : index
    %c512_26 = arith.constant 512 : index
    %69 = vector.load %arg4[%c0_25, %c512_26] : memref<1x1664xf32, #tpu.memory_space<vmem>>, vector<1x6xf32>
    %70 = arith.truncf %67 : vector<16x2xf32> to vector<16x2xbf16>
    %cst_27 = arith.constant dense<0.000000e+00> : vector<16x6xf32>
    %71 = tpu.matmul %70, %68, %cst_27 {dimension_numbers = #tpu.dot_dimension_numbers<[1], [0], [0], [1], [0, 0, 1, 1], [], []>} : vector<16x2xbf16>, vector<2x6xbf16>, vector<16x6xf32> -> vector<16x6xf32>
    %72 = vector.broadcast %69 : vector<1x6xf32> to vector<16x6xf32>
    %73 = arith.addf %71, %72 : vector<16x6xf32>
    %74 = arith.negf %73 : vector<16x6xf32>
    %75 = math.exp %74 : vector<16x6xf32>
    %cst_28 = arith.constant 1.000000e+00 : f32
    %76 = vector.broadcast %cst_28 : f32 to vector<16x6xf32>
    %77 = arith.addf %76, %75 : vector<16x6xf32>
    %78 = arith.divf %76, %77 : vector<16x6xf32>
    %c0_29 = arith.constant 0 : index
    %c640 = arith.constant 640 : index
    %79 = vector.load %arg3[%c0_29, %c640] : memref<96x1664xbf16, #tpu.memory_space<vmem>>, vector<6x94xbf16>
    %c0_30 = arith.constant 0 : index
    %c640_31 = arith.constant 640 : index
    %80 = vector.load %arg4[%c0_30, %c640_31] : memref<1x1664xf32, #tpu.memory_space<vmem>>, vector<1x94xf32>
    %81 = arith.truncf %78 : vector<16x6xf32> to vector<16x6xbf16>
    %cst_32 = arith.constant dense<0.000000e+00> : vector<16x94xf32>
    %82 = tpu.matmul %81, %79, %cst_32 {dimension_numbers = #tpu.dot_dimension_numbers<[1], [0], [0], [1], [0, 0, 1, 1], [], []>} : vector<16x6xbf16>, vector<6x94xbf16>, vector<16x94xf32> -> vector<16x94xf32>
    %83 = vector.broadcast %80 : vector<1x94xf32> to vector<16x94xf32>
    %84 = arith.addf %82, %83 : vector<16x94xf32>
    %85 = arith.mulf %59, %84 : vector<16x94xf32>
    %c0_33 = arith.constant 0 : index
    %c768 = arith.constant 768 : index
    %86 = vector.load %arg3[%c0_33, %c768] : memref<96x1664xbf16, #tpu.memory_space<vmem>>, vector<94x47xbf16>
    %c0_34 = arith.constant 0 : index
    %c768_35 = arith.constant 768 : index
    %87 = vector.load %arg4[%c0_34, %c768_35] : memref<1x1664xf32, #tpu.memory_space<vmem>>, vector<1x47xf32>
    %88 = arith.truncf %85 : vector<16x94xf32> to vector<16x94xbf16>
    %cst_36 = arith.constant dense<0.000000e+00> : vector<16x47xf32>
    %89 = tpu.matmul %88, %86, %cst_36 {dimension_numbers = #tpu.dot_dimension_numbers<[1], [0], [0], [1], [0, 0, 1, 1], [], []>} : vector<16x94xbf16>, vector<94x47xbf16>, vector<16x47xf32> -> vector<16x47xf32>
    %90 = vector.broadcast %87 : vector<1x47xf32> to vector<16x47xf32>
    %91 = arith.addf %89, %90 : vector<16x47xf32>
    %cst_37 = arith.constant 0.000000e+00 : f32
    %92 = vector.broadcast %cst_37 : f32 to vector<16x47xf32>
    %93 = arith.maximumf %91, %92 : vector<16x47xf32>
    %c0_38 = arith.constant 0 : index
    %c896 = arith.constant 896 : index
    %94 = vector.load %arg3[%c0_38, %c896] : memref<96x1664xbf16, #tpu.memory_space<vmem>>, vector<47x47xbf16>
    %c0_39 = arith.constant 0 : index
    %c896_40 = arith.constant 896 : index
    %95 = vector.load %arg4[%c0_39, %c896_40] : memref<1x1664xf32, #tpu.memory_space<vmem>>, vector<1x47xf32>
    %96 = arith.truncf %93 : vector<16x47xf32> to vector<16x47xbf16>
    %cst_41 = arith.constant dense<0.000000e+00> : vector<16x47xf32>
    %97 = tpu.matmul %96, %94, %cst_41 {dimension_numbers = #tpu.dot_dimension_numbers<[1], [0], [0], [1], [0, 0, 1, 1], [], []>} : vector<16x47xbf16>, vector<47x47xbf16>, vector<16x47xf32> -> vector<16x47xf32>
    %98 = vector.broadcast %95 : vector<1x47xf32> to vector<16x47xf32>
    %99 = arith.addf %97, %98 : vector<16x47xf32>
    %cst_42 = arith.constant 0.000000e+00 : f32
    %100 = vector.broadcast %cst_42 : f32 to vector<16x47xf32>
    %101 = arith.maximumf %99, %100 : vector<16x47xf32>
    %c0_43 = arith.constant 0 : index
    %c1024 = arith.constant 1024 : index
    %102 = vector.load %arg3[%c0_43, %c1024] : memref<96x1664xbf16, #tpu.memory_space<vmem>>, vector<47x23xbf16>
    %c0_44 = arith.constant 0 : index
    %c1024_45 = arith.constant 1024 : index
    %103 = vector.load %arg4[%c0_44, %c1024_45] : memref<1x1664xf32, #tpu.memory_space<vmem>>, vector<1x23xf32>
    %104 = arith.truncf %101 : vector<16x47xf32> to vector<16x47xbf16>
    %cst_46 = arith.constant dense<0.000000e+00> : vector<16x23xf32>
    %105 = tpu.matmul %104, %102, %cst_46 {dimension_numbers = #tpu.dot_dimension_numbers<[1], [0], [0], [1], [0, 0, 1, 1], [], []>} : vector<16x47xbf16>, vector<47x23xbf16>, vector<16x23xf32> -> vector<16x23xf32>
    %106 = vector.broadcast %103 : vector<1x23xf32> to vector<16x23xf32>
    %107 = arith.addf %105, %106 : vector<16x23xf32>
    %cst_47 = arith.constant 0.000000e+00 : f32
    %108 = vector.broadcast %cst_47 : f32 to vector<16x23xf32>
    %109 = arith.maximumf %107, %108 : vector<16x23xf32>
    %c0_48 = arith.constant 0 : index
    %c1152 = arith.constant 1152 : index
    %110 = vector.load %arg3[%c0_48, %c1152] : memref<96x1664xbf16, #tpu.memory_space<vmem>>, vector<23x23xbf16>
    %c0_49 = arith.constant 0 : index
    %c1152_50 = arith.constant 1152 : index
    %111 = vector.load %arg4[%c0_49, %c1152_50] : memref<1x1664xf32, #tpu.memory_space<vmem>>, vector<1x23xf32>
    %112 = arith.truncf %109 : vector<16x23xf32> to vector<16x23xbf16>
    %cst_51 = arith.constant dense<0.000000e+00> : vector<16x23xf32>
    %113 = tpu.matmul %112, %110, %cst_51 {dimension_numbers = #tpu.dot_dimension_numbers<[1], [0], [0], [1], [0, 0, 1, 1], [], []>} : vector<16x23xbf16>, vector<23x23xbf16>, vector<16x23xf32> -> vector<16x23xf32>
    %114 = vector.broadcast %111 : vector<1x23xf32> to vector<16x23xf32>
    %115 = arith.addf %113, %114 : vector<16x23xf32>
    %cst_52 = arith.constant 0.000000e+00 : f32
    %116 = vector.broadcast %cst_52 : f32 to vector<16x23xf32>
    %117 = arith.maximumf %115, %116 : vector<16x23xf32>
    %c0_53 = arith.constant 0 : index
    %c1280 = arith.constant 1280 : index
    %118 = vector.load %arg3[%c0_53, %c1280] : memref<96x1664xbf16, #tpu.memory_space<vmem>>, vector<23x11xbf16>
    %c0_54 = arith.constant 0 : index
    %c1280_55 = arith.constant 1280 : index
    %119 = vector.load %arg4[%c0_54, %c1280_55] : memref<1x1664xf32, #tpu.memory_space<vmem>>, vector<1x11xf32>
    %120 = arith.truncf %117 : vector<16x23xf32> to vector<16x23xbf16>
    %cst_56 = arith.constant dense<0.000000e+00> : vector<16x11xf32>
    %121 = tpu.matmul %120, %118, %cst_56 {dimension_numbers = #tpu.dot_dimension_numbers<[1], [0], [0], [1], [0, 0, 1, 1], [], []>} : vector<16x23xbf16>, vector<23x11xbf16>, vector<16x11xf32> -> vector<16x11xf32>
    %122 = vector.broadcast %119 : vector<1x11xf32> to vector<16x11xf32>
    %123 = arith.addf %121, %122 : vector<16x11xf32>
    %cst_57 = arith.constant 0.000000e+00 : f32
    %124 = vector.broadcast %cst_57 : f32 to vector<16x11xf32>
    %125 = arith.maximumf %123, %124 : vector<16x11xf32>
    %c0_58 = arith.constant 0 : index
    %c1408 = arith.constant 1408 : index
    %126 = vector.load %arg3[%c0_58, %c1408] : memref<96x1664xbf16, #tpu.memory_space<vmem>>, vector<11x11xbf16>
    %c0_59 = arith.constant 0 : index
    %c1408_60 = arith.constant 1408 : index
    %127 = vector.load %arg4[%c0_59, %c1408_60] : memref<1x1664xf32, #tpu.memory_space<vmem>>, vector<1x11xf32>
    %128 = arith.truncf %125 : vector<16x11xf32> to vector<16x11xbf16>
    %cst_61 = arith.constant dense<0.000000e+00> : vector<16x11xf32>
    %129 = tpu.matmul %128, %126, %cst_61 {dimension_numbers = #tpu.dot_dimension_numbers<[1], [0], [0], [1], [0, 0, 1, 1], [], []>} : vector<16x11xbf16>, vector<11x11xbf16>, vector<16x11xf32> -> vector<16x11xf32>
    %130 = vector.broadcast %127 : vector<1x11xf32> to vector<16x11xf32>
    %131 = arith.addf %129, %130 : vector<16x11xf32>
    %cst_62 = arith.constant 0.000000e+00 : f32
    %132 = vector.broadcast %cst_62 : f32 to vector<16x11xf32>
    %133 = arith.maximumf %131, %132 : vector<16x11xf32>
    %c0_63 = arith.constant 0 : index
    %c1536 = arith.constant 1536 : index
    %134 = vector.load %arg3[%c0_63, %c1536] : memref<96x1664xbf16, #tpu.memory_space<vmem>>, vector<11x128xbf16>
    %c0_64 = arith.constant 0 : index
    %c1536_65 = arith.constant 1536 : index
    %135 = vector.load %arg4[%c0_64, %c1536_65] : memref<1x1664xf32, #tpu.memory_space<vmem>>, vector<1x128xf32>
    %136 = arith.truncf %133 : vector<16x11xf32> to vector<16x11xbf16>
    %cst_66 = arith.constant dense<0.000000e+00> : vector<16x128xf32>
    %137 = tpu.matmul %136, %134, %cst_66 {dimension_numbers = #tpu.dot_dimension_numbers<[1], [0], [0], [1], [0, 0, 1, 1], [], []>} : vector<16x11xbf16>, vector<11x128xbf16>, vector<16x128xf32> -> vector<16x128xf32>
    %138 = vector.broadcast %135 : vector<1x128xf32> to vector<16x128xf32>
    %139 = arith.addf %137, %138 : vector<16x128xf32>
    %cst_67 = arith.constant dense<0xFF800000> : vector<16xf32>
    %140 = vector.multi_reduction <maximumf>, %139, %cst_67 [1] : vector<16x128xf32> to vector<16xf32>
    %141 = vector.shape_cast %140 : vector<16xf32> to vector<16x1xf32>
    %142 = vector.broadcast %141 : vector<16x1xf32> to vector<16x128xf32>
    %143 = arith.subf %139, %142 : vector<16x128xf32>
    %144 = math.exp %143 : vector<16x128xf32>
    %cst_68 = arith.constant dense<0.000000e+00> : vector<16xf32>
    %145 = vector.multi_reduction <add>, %144, %cst_68 [1] : vector<16x128xf32> to vector<16xf32>
    %146 = vector.shape_cast %145 : vector<16xf32> to vector<16x1xf32>
    %147 = vector.broadcast %146 : vector<16x1xf32> to vector<16x128xf32>
    %148 = arith.divf %144, %147 : vector<16x128xf32>
    %c0_69 = arith.constant 0 : index
    %c0_70 = arith.constant 0 : index
    %149 = vector.load %arg5[%c0_69, %c0_70] : memref<16x128xf32, #tpu.memory_space<vmem>>, vector<16x128xf32>
    tpu.vector_store %arg5[%c0_69, %c0_70], %148 {strides = array<i32>} : memref<16x128xf32, #tpu.memory_space<vmem>>, vector<16x128xf32>,
    return
  }
  func.func @transform_0(%arg0: i32) -> (i32, i32, i32) {
    %c0_i32 = arith.constant 0 : i32
    %c0_i32_0 = arith.constant 0 : i32
    %c0_i32_1 = arith.constant 0 : i32
    return %arg0, %c0_i32, %c0_i32_0 : i32, i32, i32
  }
  func.func @transform_1(%arg0: i32) -> (i32, i32) {
    %c0_i32 = arith.constant 0 : i32
    %c0_i32_0 = arith.constant 0 : i32
    return %arg0, %c0_i32 : i32, i32
  }
  func.func @transform_2(%arg0: i32) -> (i32, i32) {
    %c0_i32 = arith.constant 0 : i32
    %c0_i32_0 = arith.constant 0 : i32
    %c0_i32_1 = arith.constant 0 : i32
    return %c0_i32, %c0_i32_0 : i32, i32
  }
  func.func @transform_3(%arg0: i32) -> (i32, i32) {
    %c0_i32 = arith.constant 0 : i32
    %c0_i32_0 = arith.constant 0 : i32
    %c0_i32_1 = arith.constant 0 : i32
    return %c0_i32, %c0_i32_0 : i32, i32
  }
  func.func @transform_4(%arg0: i32) -> (i32, i32) {
    %c0_i32 = arith.constant 0 : i32
    %c0_i32_0 = arith.constant 0 : i32
    return %arg0, %c0_i32 : i32, i32
  }
}

</mosaic_0001>

<bundles_post_ra>
// kernel: tpu_custom_call.1
= control target key start
LH: loop header
LB: loop body
LE: loop exit
PB: predicated region body
PF: predicated region fallthrough
CT: control target
= control target key end

     0   :  { %9 = vsyncpa [#allocation3], 0  ;;  %s3031_s0 = inlined_call_operand.hbm [shape: f32[16,8,47], index: 0, kind: input, shape index: {}]   ;;  %s3032_s1 = inlined_call_operand.vmem [shape: s32[16,8], index: 1, kind: input, shape index: {}]   ;;  %s3033_s2 = inlined_call_operand.hbm [shape: bf16[96,1664], index: 2, kind: input, shape index: {}]   ;;  %s3034_s3 = inlined_call_operand.vmem [shape: f32[1,1664], index: 3, kind: input, shape index: {}]   ;;  %s3035_s4 = inlined_call_operand.hbm [shape: f32[16,128], index: 4, kind: output, shape index: {}]  }
   0x1   :  { %10 = vsyncpa [#allocation6], 0 }
   0x2   :  { %11 = vsyncpa [#allocation4], 0  ;;  %s2427_s15 = smov [#allocation2]  }
   0x3   :  { %s17_s16 = sshll.u32 %s2427_s15, 4  ;;  %s18_s16 = int_to_ptr.vmem [resolvable:$true] %s17_s16 }
   0x4   :  { %s2369_s17 = scalar_lea.vmem %s18_s16, 2048  ;;  %p2374_p1 = scmp.lt.s32.totalorder %s18_s16, %s18_s16 }
   0x5   :  { %p2370_p0 = scmp.ne.s32.totalorder %s18_s16, %s2369_s17  ;;  %p2375_p2 = scmp.lt.s32.totalorder %s2369_s17, %s2369_s17 }
   0x7   :  { %p2376_p3 = por %p2375_p2, %p2374_p1 }
   0x9   :  { %p2377_p4 = pnand %p2376_p3, %p2370_p0 }
   0xb   :  { %2380 = shalt.err (!%p2377_p4)
}
   0xc   :  { %s2428_s18 = smov 128   ;;  %s2429_s19 = smov 8  }
   0xd   :  { %23 = dma.hbm_to_vmem [thread:$0]  %s3031_s0, 2048, %s18_s16, [#allocation3], %s2428_s18, %s2428_s18, %s2429_s19  }
   0xe   :  { %s2430_s22 = smov [#allocation5]  }
   0xf   :  { %s31_s23 = sshll.u32 %s2430_s22, 4  ;;  %s32_s23 = int_to_ptr.vmem [resolvable:$true] %s31_s23 }
  0x10   :  { %s2389_s24 = scalar_lea.vmem %s32_s23, 9984  ;;  %p2394_p6 = scmp.lt.s32.totalorder %s32_s23, %s32_s23 }
  0x11   :  { %p2390_p5 = scmp.ne.s32.totalorder %s32_s23, %s2389_s24  ;;  %p2395_p7 = scmp.lt.s32.totalorder %s2389_s24, %s2389_s24 }
  0x13   :  { %p2396_p8 = por %p2395_p7, %p2394_p6 }
  0x15   :  { %p2397_p9 = pnand %p2396_p8, %p2390_p5 }
  0x17   :  { %2400 = shalt.err (!%p2397_p9)
}
  0x18   :  { %s2431_s25 = smov 832   ;;  %s2432_s26 = smov 52  }
  0x19   :  { %37 = dma.hbm_to_vmem [thread:$0]  %s3033_s2, 9984, %s32_s23, [#allocation6], %s2431_s25, %s2431_s25, %s2432_s26  }
  0x1a   :  { %2421 = dma.done.wait [#allocation3], 2048  }
  0x1b   :  { %2422 = vsyncadd [#allocation3], 4294965248 }
  0x1c   :  { %2423 = dma.done.wait [#allocation6], 9984  }
  0x1d   :  { %2424 = vsyncadd [#allocation6], 4294957312  ;;  %vm211_vm0 = vcmask 1046528   ;;  %v2433_v0 = vmov 0   ;;  %vm212_vm1 = vcmask 1047552   ;;  %v3036_v1 = vmov 65535  }
  0x1e   :  { %256 = vmatprep.mubr.bf16.mxu0 %v2433_v0  ;;  %v213_v2 = vsel %vm211_vm0, 4294967295, %v3036_v1  ;;  %vm65_vm2 = vcmask 64512   ;;  %v63_v3 = vld [vmem:[%s3032_s1] sm:$0xff]  ;;  %v64_v4 = vld [vmem:[%s3032_s1 + $0x8] sm:$0xff]  ;;  %vm186_vm3 = vcmask 384000   ;;  %vm818_vm4 = vcmask 1041409  }
  0x1f   :  { %v2482_v5 = vsel %vm212_vm1, %v213_v2, 0  ;;  %v66_v6 = vsel %vm65_vm2, %v63_v3, 0  ;;  %v79_v7 = vsel %vm65_vm2, %v64_v4, 0  ;;  %v2269_v8 = vld [vmem:[#allocation5 + $0xd4] ss:$52 sps:$4 sm:$0xff]   ;;  %v47_v20 = vld [vmem:[#allocation2] sm:$0xff]  ;;  %v92_v55 = vlaneseq }
  0x20   :  { %v68_v9 = vshrl.u32 %v66_v6, 16  ;;  %v67_v10 = vand.u32 65535, %v66_v6  ;;  %v81_v11 = vshrl.u32 %v79_v7, 16  ;;  %v80_v12 = vand.u32 65535, %v79_v7  ;;  %v2271_v13 = vld [vmem:[#allocation5 + $0xd0] ss:$52 sps:$4 sm:$0xff]  }
  0x21   :  { %v219_v14 = vand.u32 %v2269_v8, %v2482_v5  ;;  %v2272_v17 = vld [vmem:[#allocation5 + $0x6c] ss:$52 sps:$4 sm:$0xff]   ;;  %v216_v19 = vand.u32 %v2271_v13, %v2482_v5  ;;  %v1175_v24 = vrot.slane %v47_v20, 7  ;;  %v2274_v26 = vld [vmem:[#allocation5 + $0x68] ss:$52 sps:$4 sm:$0xff]   ;;  %v2495_v35 = vld [vmem:[#allocation2 + $0x10] sm:$0xff] }
  0x22   :  { %v70_v15 = vcvt.s32.f32 %v68_v9  ;;  %v69_v16 = vcvt.s32.f32 %v67_v10  ;;  %v83_v18 = vcvt.s32.f32 %v81_v11  ;;  %v48_v21 = vld [vmem:[#allocation2 + $0x8] sm:$0xff]  ;;  %v82_v22 = vcvt.s32.f32 %v80_v12  ;;  %v2275_v27 = vld [vmem:[#allocation5 + $0x4] ss:$52 sps:$4 sm:$0xff]   ;;  %v2277_v33 = vld [vmem:[#allocation5] ss:$52 sps:$4 sm:$0xff]   ;;  %3074 = vst [vmem:[#allocation13_spill] sm:$0xff] %v2495_v35 }
  0x23   :  { %234 = vmatprep.subr.bf16.mxu0 %v219_v14  ;;  %v117_v23 = vpack.c.bf16 %v48_v21, %v47_v20  ;;  %v1176_v25 = vrot.slane %v48_v21, 6  ;;  %v55_v29 = vld [vmem:[#allocation2 + $0x40] sm:$0xff]  ;;  %v56_v30 = vld [vmem:[#allocation2 + $0x48] sm:$0xff]  ;;  %v2498_v36 = vld [vmem:[#allocation2 + $0x18] sm:$0xff]  ;;  %v3038_v37 = vmov 0.0   ;;  %v2568_v61 = vshrl.u32 %v92_v55, 7 }
  0x24   :  { %73 = vadd.xlane.f32.xlu0 %v70_v15  ;;  %71 = vadd.xlane.f32.xlu1 %v69_v16  ;;  %v1189_v31 = vrot.slane %v55_v29, 7  ;;  %v1190_v32 = vrot.slane %v56_v30, 6  ;;  %3075 = vst [vmem:[#allocation14_spill] sm:$0xff] %v2498_v36  ;;  %v2504_v38 = vpack.c.bf16 %v2498_v36, %v2495_v35  ;;  %v2506_v39 = vld [vmem:[#allocation2 + $0x20] sm:$0xff]  ;;  %v2508_v40 = vld [vmem:[#allocation2 + $0x28] sm:$0xff]  ;;  %v2520_v42 = vld [vmem:[#allocation2 + $0x30] sm:$0xff]  ;;  %v2531_v45 = vpack.c.bf16 %v56_v30, %v55_v29 }
  0x25   :  { %235 = vmatpush1.bf16.msra.mxu0 %v216_v19  ;;  %v2489_v28 = vsel %vm818_vm4, %v1176_v25, %v1175_v24  ;;  %2149 = vmatprep.mubr.msk.bf16.mxu1 %vm186_vm3, %v117_v23  ;;  %3076 = vst [vmem:[#allocation15_spill] sm:$0xff] %v2506_v39  ;;  %3077 = vst [vmem:[#allocation16_spill] sm:$0xff] %v2508_v40  ;;  %v2515_v41 = vpack.c.bf16 %v2508_v40, %v2506_v39  ;;  %v2522_v43 = vld [vmem:[#allocation2 + $0x38] sm:$0xff]  ;;  %v2536_v46 = vld [vmem:[#allocation2 + $0x50] sm:$0xff]  ;;  %v2575_v8 = vsub.s32 1, %v2568_v61  ;;  %vm820_vm7 = vcmask 1042434  }
  0x26   :  { %236 = vmatprep.subr.bf16.mxu0 %v2272_v17  ;;  %3072 = vst [vmem:[#allocation11_spill] sm:$0xff] %v2489_v28  ;;  %v2493_v34 = vsel %vm818_vm4, %v1190_v32, %v1189_v31  ;;  %3078 = vst [vmem:[#allocation17_spill] sm:$0xff] %v2520_v42  ;;  %v2526_v44 = vpack.c.bf16 %v2522_v43, %v2520_v42  ;;  %v2538_v47 = vld [vmem:[#allocation2 + $0x58] sm:$0xff]  ;;  %v2547_v49 = vld [vmem:[#allocation2 + $0x60] sm:$0xff]  ;;  %v2578_v9 = vsub.s32 0, %v2568_v61  ;;  %v2588_v15 = vsub.s32 2, %v2568_v61 }
  0x27   :  { %3073 = vst [vmem:[#allocation12_spill] sm:$0xff] %v2493_v34  ;;  %3079 = vst [vmem:[#allocation18_spill] sm:$0xff] %v2522_v43  ;;  %v2542_v48 = vpack.c.bf16 %v2538_v47, %v2536_v46  ;;  %v2549_v50 = vld [vmem:[#allocation2 + $0x68] sm:$0xff]  ;;  %v2558_v52 = vld [vmem:[#allocation2 + $0x70] sm:$0xff]  ;;  %v2596_v19 = vsub.s32 3, %v2568_v61  ;;  %v2606_v25 = vsub.s32 5, %v2568_v61 }
  0x28   :  { %86 = vadd.xlane.f32.xlu0 %v83_v18  ;;  %84 = vadd.xlane.f32.xlu1 %v82_v22  ;;  %3080 = vst [vmem:[#allocation19_spill] sm:$0xff] %v2536_v46  ;;  %3081 = vst [vmem:[#allocation20_spill] sm:$0xff] %v2538_v47  ;;  %v2553_v51 = vpack.c.bf16 %v2549_v50, %v2547_v49  ;;  %v2560_v53 = vld [vmem:[#allocation2 + $0x78] sm:$0xff]  ;;  %v2601_v22 = vsub.s32 4, %v2568_v61  ;;  %v2611_v29 = vsub.s32 6, %v2568_v61  ;;  %v2616_v32 = vsub.s32 7, %v2568_v61 }
  0x29   :  { %237 = vmatpush1.bf16.msra.mxu0 %v2274_v26  ;;  %3082 = vst [vmem:[#allocation21_spill] sm:$0xff] %v2542_v48  ;;  %3083 = vst [vmem:[#allocation22_spill] sm:$0xff] %v2547_v49  ;;  %v2564_v54 = vpack.c.bf16 %v2560_v53, %v2558_v52  ;;  %vm822_vm8 = vcmask 1043459   ;;  %vm824_vm9 = vcmask 1044484   ;;  %vm826_vm10 = vcmask 1045509   ;;  %s2436_s6 = smov 47  }
  0x2a   :  { %238 = vmatprep.subr.bf16.mxu0 %v2275_v27  ;;  %3084 = vst [vmem:[#allocation23_spill] sm:$0xff] %v2549_v50  ;;  %3085 = vst [vmem:[#allocation24_spill] sm:$0xff] %v2553_v51  ;;  %vm828_vm11 = vcmask 1046534   ;;  %vm830_vm12 = vcmask 1047559  }
  0x2b   :  { %3086 = vst [vmem:[#allocation25_spill] sm:$0xff] %v2558_v52  ;;  %3087 = vst [vmem:[#allocation26_spill] sm:$0xff] %v2560_v53 }
  0x2c   :  { %3088 = vst [vmem:[#allocation27_spill] sm:$0xff] %v2564_v54  ;;  %3089 = vst [vmem:[#allocation28_spill] sm:$0xff] %v2575_v8 }
  0x2d   :  { %239 = vmatpush1.bf16.msra.mxu0 %v2277_v33  ;;  %3090 = vst [vmem:[#allocation29_spill] sm:$0xff] %v2578_v9  ;;  %3091 = vst [vmem:[#allocation30_spill] sm:$0xff] %v2588_v15 }
  0x2e   :  { %2193 = vmatprep.subr.bf16.mxu0 %v3038_v37  ;;  %3092 = vst [vmem:[#allocation31_spill] sm:$0xff] %v2596_v19  ;;  %3093 = vst [vmem:[#allocation32_spill] sm:$0xff] %v2601_v22 }
  0x2f   :  { %3094 = vst [vmem:[#allocation33_spill] sm:$0xff] %v2606_v25  ;;  %3095 = vst [vmem:[#allocation34_spill] sm:$0xff] %v2611_v29 }
  0x30   :  { %2034 = vmatmul.mubr.msk.bf16.vlgmr.msra.gmra.mxu0 %vm186_vm3, %v117_v23  ;;  %3096 = vst [vmem:[#allocation35_spill] sm:$0xff] %v2616_v32 }
  0x31   :  { %266 = vmatprep.mubr.bf16.mxu0 %v2433_v0 }
  0x38   :  { %2035 = vmatmul.mubr.msk.bf16.gmra.mxu0 %vm186_vm3, %v2504_v38 }
  0x39   :  { %276 = vmatprep.mubr.bf16.mxu0 %v2433_v0 }
  0x40   :  { %2036 = vmatmul.mubr.msk.bf16.gmra.mxu0 %vm186_vm3, %v2515_v41 }
  0x41   :  { %286 = vmatprep.mubr.bf16.mxu0 %v2433_v0 }
  0x48   :  { %2037 = vmatmul.mubr.msk.bf16.gmra.mxu0 %vm186_vm3, %v2526_v44 }
  0x49   :  { %296 = vmatprep.mubr.bf16.mxu0 %v2433_v0 }
  0x50   :  { %2038 = vmatmul.mubr.msk.bf16.gmra.mxu0 %vm186_vm3, %v2531_v45 }
  0x51   :  { %306 = vmatprep.mubr.bf16.mxu0 %v2433_v0 }
  0x58   :  { %2039 = vmatmul.mubr.msk.bf16.gmra.mxu0 %vm186_vm3, %v2542_v48 }
  0x59   :  { %316 = vmatprep.mubr.bf16.mxu0 %v2433_v0 }
  0x60   :  { %2040 = vmatmul.mubr.msk.bf16.gmra.mxu0 %vm186_vm3, %v2553_v51 }
  0x61   :  { %326 = vmatprep.mubr.bf16.mxu0 %v2433_v0  ;;  %v2570_v0 = vand.u32 127, %v92_v55 }
  0x68   :  { %2041 = vmatmul.mubr.msk.bf16.gmra.mxu0 %vm186_vm3, %v2564_v54 }
  0xad   :  { %v74_v56 = vpop.xlane.xlu0 %73  ;;  %v72_v57 = vpop.xlane.xlu1 %71 }
  0xae   :  { %v76_v58 = vcvt.f32.s32 %v74_v56  ;;  %v75_v59 = vcvt.f32.s32 %v72_v57 }
  0xb0   :  { %v77_v60 = vshll.u32 %v76_v58, 16 }
  0xb1   :  { %v87_v62 = vpop.xlane.xlu0 %86  ;;  %v85_v63 = vpop.xlane.xlu1 %84 }
  0xb2   :  { %v78_v2 = vadd.s32 %v77_v60, %v75_v59  ;;  %v89_v3 = vcvt.f32.s32 %v87_v62  ;;  %v88_v4 = vcvt.f32.s32 %v85_v63 }
  0xb4   :  { %v2572_v6 = vadd.s32 4294967295, %v78_v2  ;;  %v90_v7 = vshll.u32 %v89_v3, 16 }
  0xb6   :  { %vm96_vm5 = vcmp.eq.s32.totalorder %v2570_v0, %v2572_v6  ;;  %v91_v10 = vadd.s32 %v90_v7, %v88_v4  ;;  %vm102_vm14 = vcmp.lt.s32.totalorder %v2570_v0, %v2572_v6 }
  0xb7   :  { %v2023_v11 = vsel %vm96_vm5, 1.0, %v3038_v37  ;;  %vm1329_vm5 = vcmask 1040384  }
  0xb8   :  { %v2583_v12 = vadd.s32 4294967295, %v91_v10  ;;  %v444_v13 = vrot.slane %v2023_v11, %v2575_v8  ;;  %v437_v14 = vrot.slane %v2023_v11, %v2578_v9  ;;  %v451_v17 = vrot.slane %v2023_v11, %v2588_v15 }
  0xb9   :  { %v458_v20 = vrot.slane %v2023_v11, %v2596_v19  ;;  %v465_v23 = vrot.slane %v2023_v11, %v2601_v22  ;;  %v472_v26 = vrot.slane %v2023_v11, %v2606_v25  ;;  %v479_v30 = vrot.slane %v2023_v11, %v2611_v29 }
  0xba   :  { %vm97_vm6 = vcmp.eq.s32.totalorder %v2570_v0, %v2583_v12  ;;  %446 = vbcast.lane.b32.xlu1 %v444_v13, 256  ;;  %439 = vbcast.lane.b32.xlu0 %v437_v14, 256  ;;  %v486_v33 = vrot.slane %v2023_v11, %v2616_v32  ;;  %vm103_vm13 = vcmp.lt.s32.totalorder %v2570_v0, %v2583_v12  ;;  %v3106_v12 = vld [vmem:[#allocation15_spill] sm:$0xff] }
  0xbb   :  { %v2024_v16 = vsel %vm97_vm6, 1.0, %v3038_v37  ;;  %vm1325_vm6 = vcmask 15360  }
  0xbc   :  { %v493_v18 = vrot.slane %v2024_v16, %v2578_v9  ;;  %v500_v21 = vrot.slane %v2024_v16, %v2575_v8  ;;  %v507_v24 = vrot.slane %v2024_v16, %v2588_v15  ;;  %v514_v27 = vrot.slane %v2024_v16, %v2596_v19 }
  0xbd   :  { %v521_v31 = vrot.slane %v2024_v16, %v2601_v22  ;;  %v528_v55 = vrot.slane %v2024_v16, %v2606_v25  ;;  %v535_v56 = vrot.slane %v2024_v16, %v2611_v29  ;;  %v542_v57 = vrot.slane %v2024_v16, %v2616_v32 }
  0xbe   :  { %453 = vbcast.lane.b32.xlu0 %v451_v17, 256  ;;  %495 = vbcast.lane.b32.xlu1 %v493_v18, 256 }
  0xc2   :  { %460 = vbcast.lane.b32.xlu0 %v458_v20, 256  ;;  %502 = vbcast.lane.b32.xlu1 %v500_v21, 256 }
  0xc6   :  { %467 = vbcast.lane.b32.xlu0 %v465_v23, 256  ;;  %509 = vbcast.lane.b32.xlu1 %v507_v24, 256 }
  0xca   :  { %474 = vbcast.lane.b32.xlu0 %v472_v26, 256  ;;  %516 = vbcast.lane.b32.xlu1 %v514_v27, 256 }
  0xce   :  { %481 = vbcast.lane.b32.xlu0 %v479_v30, 256  ;;  %523 = vbcast.lane.b32.xlu1 %v521_v31, 256 }
  0xd2   :  { %488 = vbcast.lane.b32.xlu0 %v486_v33, 256  ;;  %530 = vbcast.lane.b32.xlu1 %v528_v55, 256 }
  0xd6   :  { %537 = vbcast.lane.b32.xlu1 %v535_v56, 256  ;;  %v2631_v56 = vld [vmem:[%s3034_s3] sm:$0x7] }
  0xd7   :  { %3097 = vst [vmem:[#allocation36_spill] sm:$0xff] %v2631_v56  ;;  %v2639_v37 = vrot.slane %v2631_v56, %v2575_v8 }
  0xda   :  { %544 = vbcast.lane.b32.xlu1 %v542_v57, 256  ;;  %v2635_v57 = vrot.slane %v2631_v56, %v2578_v9 }
  0xf0   :  { %v258_v58 = vpop.f32.mrf.mxu0 }
  0xf1   :  { %v259_v53 = vadd.f32 %v258_v58, %v2635_v57 }
  0xf2   :  { %v260_v59 = vpop.f32.mrf.mxu0 }
  0xf3   :  { %v2644_v32 = vadd.f32 %v260_v59, %v2639_v37 }
  0xf4   :  { %v262_v60 = vpop.f32.mrf.mxu0 }
  0xf5   :  { %v263_v52 = vadd.f32 %v262_v60, %v2635_v57 }
  0xf6   :  { %v264_v62 = vpop.f32.mrf.mxu0 }
  0xf7   :  { %v2647_v42 = vadd.f32 %v264_v62, %v2639_v37 }
  0xf8   :  { %v268_v63 = vpop.f32.mrf.mxu0 }
  0xf9   :  { %v269_v29 = vadd.f32 %v268_v63, %v2635_v57 }
  0xfa   :  { %v270_v2 = vpop.f32.mrf.mxu0 }
  0xfb   :  { %v2651_v25 = vadd.f32 %v270_v2, %v2639_v37 }
  0xfc   :  { %v272_v3 = vpop.f32.mrf.mxu0 }
  0xfd   :  { %v273_v56 = vadd.f32 %v272_v3, %v2635_v57 }
  0xfe   :  { %v274_v4 = vpop.f32.mrf.mxu0 }
  0xff   :  { %v2656_v9 = vadd.f32 %v274_v4, %v2639_v37 }
 0x100   :  { %v278_v7 = vpop.f32.mrf.mxu0 }
 0x101   :  { %v279_v59 = vadd.f32 %v278_v7, %v2635_v57 }
 0x102   :  { %v280_v10 = vpop.f32.mrf.mxu0 }
 0x103   :  { %v2660_v62 = vadd.f32 %v280_v10, %v2639_v37 }
 0x104   :  { %v282_v11 = vpop.f32.mrf.mxu0 }
 0x105   :  { %v2663_v63 = vadd.f32 %v282_v11, %v2635_v57 }
 0x106   :  { %v2622_v13 = vpop.f32.mrf.mxu0 }
 0x108   :  { %v288_v14 = vpop.f32.mrf.mxu0 }
 0x109   :  { %v2666_v2 = vadd.f32 %v288_v14, %v2635_v57 }
 0x10a   :  { %v2624_v17 = vpop.f32.mrf.mxu0 }
 0x10c   :  { %v292_v18 = vpop.f32.mrf.mxu0 }
 0x10d   :  { %v2669_v3 = vadd.f32 %v292_v18, %v2635_v57 }
 0x10e   :  { %v2626_v20 = vpop.f32.mrf.mxu0 }
 0x110   :  { %v298_v16 = vpop.f32.mrf.mxu0 }
 0x111   :  { %v299_v58 = vadd.f32 %v298_v16, %v2635_v57 }
 0x112   :  { %v300_v21 = vpop.f32.mrf.mxu0 }
 0x114   :  { %v302_v23 = vpop.f32.mrf.mxu0 }
 0x115   :  { %v303_v10 = vadd.f32 %v302_v23, %v2635_v57 }
 0x116   :  { %v304_v24 = vpop.f32.mrf.mxu0 }
 0x117   :  { %v2678_v14 = vadd.f32 %v304_v24, %v2639_v37 }
 0x118   :  { %v308_v26 = vpop.f32.mrf.mxu0 }
 0x119   :  { %v309_v34 = vadd.f32 %v308_v26, %v2635_v57 }
 0x11a   :  { %v310_v27 = vpop.f32.mrf.mxu0 }
 0x11c   :  { %v312_v30 = vpop.f32.mrf.mxu0 }
 0x11e   :  { %v314_v31 = vpop.f32.mrf.mxu0 }
 0x11f   :  { %v2688_v40 = vadd.f32 %v314_v31, %v2639_v37 }
 0x120   :  { %v318_v33 = vpop.f32.mrf.mxu0 }
 0x121   :  { %v2691_v24 = vadd.f32 %v318_v33, %v2635_v57 }
 0x122   :  { %v320_v55 = vpop.f32.mrf.mxu0 }
 0x124   :  { %v322_v1 = vpop.f32.mrf.mxu0 }
 0x126   :  { %v324_v43 = vpop.f32.mrf.mxu0 }
 0x127   :  { %v2704_v47 = vadd.f32 %v324_v43, %v2639_v37 }
 0x12c   :  { %v440_v22 = vpop.permute.xlu0 %439  ;;  %v447_v19 = vpop.permute.xlu1 %446 }
 0x12d   :  { %v546_v15 = vmul.f32 %v440_v22, %v259_v53  ;;  %v547_v60 = vmul.f32 %v447_v19, %v263_v52  ;;  %v328_v19 = vpop.f32.mrf.mxu0  ;;  %v2674_v22 = vadd.f32 %v300_v21, %v2639_v37  ;;  %v313_v21 = vadd.f32 %v312_v30, %v2635_v57 }
 0x12f   :  { %v562_v53 = vsel %vm186_vm3, %v546_v15, 0.0  ;;  %v569_v52 = vsel %vm186_vm3, %v547_v60, 0.0  ;;  %v2682_v60 = vadd.f32 %v310_v27, %v2639_v37 }
 0x130   :  { %v563_v4 = vrot.slane %v562_v53, 4  ;;  %v570_v7 = vrot.slane %v569_v52, 4  ;;  %v454_v11 = vpop.permute.xlu0 %453  ;;  %v496_v16 = vpop.permute.xlu1 %495 }
 0x131   :  { %v548_v8 = vmul.f32 %v454_v11, %v269_v29  ;;  %v554_v18 = vmul.f32 %v496_v16, %v299_v58  ;;  %v2693_v29 = vpop.f32.mrf.mxu0  ;;  %v2699_v11 = vadd.f32 %v322_v1, %v2635_v57 }
 0x132   :  { %v564_v15 = vadd.f32 %v563_v4, %v562_v53  ;;  %v571_v28 = vadd.f32 %v570_v7, %v569_v52 }
 0x133   :  { %v576_v50 = vsel %vm186_vm3, %v548_v8, 0.0  ;;  %v618_v23 = vsel %vm186_vm3, %v554_v18, 0.0  ;;  %v2696_v8 = vadd.f32 %v320_v55, %v2639_v37 }
 0x134   :  { %v565_v26 = vrot.slane %v564_v15, 2  ;;  %v572_v58 = vrot.slane %v571_v28, 2  ;;  %v577_v53 = vrot.slane %v576_v50, 4  ;;  %v619_v52 = vrot.slane %v618_v23, 4  ;;  %v461_v27 = vpop.permute.xlu0 %460  ;;  %v503_v4 = vpop.permute.xlu1 %502 }
 0x135   :  { %v549_v7 = vmul.f32 %v461_v27, %v273_v56  ;;  %v555_v30 = vmul.f32 %v503_v4, %v303_v10  ;;  %v2707_v56 = vadd.f32 %v328_v19, %v2635_v57  ;;  %v332_v10 = vpop.f32.mrf.mxu0 }
 0x136   :  { %v566_v31 = vadd.f32 %v565_v26, %v564_v15  ;;  %v573_v16 = vadd.f32 %v572_v58, %v571_v28  ;;  %v578_v33 = vadd.f32 %v577_v53, %v576_v50  ;;  %v620_v18 = vadd.f32 %v619_v52, %v618_v23 }
 0x137   :  { %v583_v49 = vsel %vm186_vm3, %v549_v7, 0.0  ;;  %v625_v39 = vsel %vm186_vm3, %v555_v30, 0.0  ;;  %v2710_v28 = vadd.f32 %v332_v10, %v2635_v57 }
 0x138   :  { %v621_v55 = vrot.slane %v620_v18, 2  ;;  %v584_v27 = vrot.slane %v583_v49, 4  ;;  %v626_v4 = vrot.slane %v625_v39, 4  ;;  %v468_v1 = vpop.permute.xlu0 %467  ;;  %v510_v36 = vpop.permute.xlu1 %509  ;;  %v574_v23 = vrot.slane %v573_v16, 1 }
 0x139   :  { %v550_v50 = vmul.f32 %v468_v1, %v279_v59  ;;  %v556_v15 = vmul.f32 %v510_v36, %v309_v34  ;;  %v567_v26 = vrot.slane %v566_v31, 1  ;;  %v579_v58 = vrot.slane %v578_v33, 2 }
 0x13a   :  { %v622_v53 = vadd.f32 %v621_v55, %v620_v18  ;;  %v585_v43 = vadd.f32 %v584_v27, %v583_v49  ;;  %v627_v52 = vadd.f32 %v626_v4, %v625_v39  ;;  %v575_v30 = vadd.f32 %v574_v23, %v573_v16 }
 0x13b   :  { %v590_v19 = vsel %vm186_vm3, %v550_v50, 0.0  ;;  %v632_v7 = vsel %vm186_vm3, %v556_v15, 0.0  ;;  %v568_v46 = vadd.f32 %v567_v26, %v566_v31  ;;  %v580_v39 = vadd.f32 %v579_v58, %v578_v33 }
 0x13c   :  { %v586_v35 = vrot.slane %v585_v43, 2  ;;  %v628_v54 = vrot.slane %v627_v52, 2  ;;  %v591_v51 = vrot.slane %v590_v19, 4  ;;  %v633_v48 = vrot.slane %v632_v7, 4  ;;  %v475_v57 = vpop.permute.xlu0 %474  ;;  %v517_v10 = vpop.permute.xlu1 %516 }
 0x13d   :  { %v551_v34 = vmul.f32 %v475_v57, %v2663_v63  ;;  %v557_v36 = vmul.f32 %v517_v10, %v313_v21  ;;  %v675_v59 = vmul.f32 %v575_v30, %v2647_v42  ;;  %v674_v49 = vmul.f32 %v568_v46, %v2644_v32 }
 0x13e   :  { %v629_v18 = vadd.f32 %v628_v54, %v627_v52  ;;  %v592_v55 = vadd.f32 %v591_v51, %v590_v19  ;;  %v634_v27 = vadd.f32 %v633_v48, %v632_v7  ;;  %v2721_v50 = vadd.f32 %v586_v35, %v585_v43 }
 0x13f   :  { %v597_v16 = vsel %vm186_vm3, %v551_v34, 0.0  ;;  %v639_v31 = vsel %vm186_vm3, %v557_v36, 0.0  ;;  %v693_v4 = vsel %vm186_vm3, %v675_v59, 0.0  ;;  %v690_v1 = vsel %vm186_vm3, %v674_v49, 0.0 }
 0x140   :  { %v635_v63 = vrot.slane %v634_v27, 2  ;;  %v598_v21 = vrot.slane %v597_v16, 4  ;;  %v640_v15 = vrot.slane %v639_v31, 4  ;;  %694 = vadd.xlane.f32.xlu1 %v693_v4  ;;  %691 = vadd.xlane.f32.xlu0 %v690_v1  ;;  %v482_v42 = vpop.permute.xlu0 %481  ;;  %v524_v46 = vpop.permute.xlu1 %523  ;;  %v623_v54 = vrot.slane %v622_v53, 1 }
 0x141   :  { %v552_v51 = vmul.f32 %v482_v42, %v2666_v2  ;;  %v558_v48 = vmul.f32 %v524_v46, %v2691_v24  ;;  %v630_v32 = vrot.slane %v629_v18, 1  ;;  %v593_v33 = vrot.slane %v592_v55, 2 }
 0x142   :  { %v636_v23 = vadd.f32 %v635_v63, %v634_v27  ;;  %v599_v26 = vadd.f32 %v598_v21, %v597_v16  ;;  %v641_v58 = vadd.f32 %v640_v15, %v639_v31  ;;  %v624_v52 = vadd.f32 %v623_v54, %v622_v53 }
 0x143   :  { %v604_v35 = vsel %vm186_vm3, %v552_v51, 0.0  ;;  %v646_v43 = vsel %vm186_vm3, %v558_v48, 0.0  ;;  %v631_v19 = vadd.f32 %v630_v32, %v629_v18  ;;  %v594_v27 = vadd.f32 %v593_v33, %v592_v55 }
 0x144   :  { %v600_v7 = vrot.slane %v599_v26, 2  ;;  %v642_v30 = vrot.slane %v641_v58, 2  ;;  %v605_v57 = vrot.slane %v604_v35, 4  ;;  %v647_v10 = vrot.slane %v646_v43, 4  ;;  %v489_v34 = vpop.permute.xlu0 %488  ;;  %v531_v2 = vpop.permute.xlu1 %530 }
 0x145   :  { %v682_v24 = vmul.f32 %v624_v52, %v2674_v22  ;;  %v553_v36 = vmul.f32 %v489_v34, %v2669_v3  ;;  %v559_v59 = vmul.f32 %v531_v2, %v2699_v11  ;;  %v683_v49 = vmul.f32 %v631_v19, %v2678_v14 }
 0x146   :  { %v643_v16 = vadd.f32 %v642_v30, %v641_v58  ;;  %v606_v31 = vadd.f32 %v605_v57, %v604_v35  ;;  %v648_v4 = vadd.f32 %v647_v10, %v646_v43  ;;  %v601_v53 = vadd.f32 %v600_v7, %v599_v26 }
 0x147   :  { %v714_v18 = vsel %vm186_vm3, %v682_v24, 0.0  ;;  %v611_v1 = vsel %vm186_vm3, %v553_v36, 0.0  ;;  %v653_v63 = vsel %vm186_vm3, %v559_v59, 0.0  ;;  %v717_v3 = vsel %vm186_vm3, %v683_v49, 0.0 }
 0x148   :  { %v649_v21 = vrot.slane %v648_v4, 2  ;;  %715 = vadd.xlane.f32.xlu0 %v714_v18  ;;  %v612_v22 = vrot.slane %v611_v1, 4  ;;  %v654_v15 = vrot.slane %v653_v63, 4  ;;  %v538_v11 = vpop.permute.xlu1 %537  ;;  %v637_v55 = vrot.slane %v636_v23, 1 }
 0x149   :  { %v560_v14 = vmul.f32 %v538_v11, %v2707_v56  ;;  %v581_v42 = vrot.slane %v580_v39, 1  ;;  %v644_v46 = vrot.slane %v643_v16, 1  ;;  %v607_v51 = vrot.slane %v606_v31, 2 }
 0x14a   :  { %v650_v48 = vadd.f32 %v649_v21, %v648_v4  ;;  %v613_v54 = vadd.f32 %v612_v22, %v611_v1  ;;  %v655_v32 = vadd.f32 %v654_v15, %v653_v63  ;;  %v638_v26 = vadd.f32 %v637_v55, %v636_v23 }
 0x14b   :  { %v660_v33 = vsel %vm186_vm3, %v560_v14, 0.0  ;;  %v582_v58 = vadd.f32 %v581_v42, %v580_v39  ;;  %v645_v35 = vadd.f32 %v644_v46, %v643_v16  ;;  %v588_v30 = vrot.slane %v2721_v50, 1 }
 0x14c   :  { %v614_v43 = vrot.slane %v613_v54, 2  ;;  %v656_v52 = vrot.slane %v655_v32, 2  ;;  %718 = vadd.xlane.f32.xlu0 %v717_v3  ;;  %v661_v19 = vrot.slane %v660_v33, 4  ;;  %v545_v7 = vpop.permute.xlu1 %544  ;;  %v684_v56 = vmul.f32 %v638_v26, %v2682_v60 }
 0x14d   :  { %v676_v57 = vmul.f32 %v582_v58, %v2651_v25  ;;  %v561_v10 = vmul.f32 %v545_v7, %v2710_v28  ;;  %v685_v34 = vmul.f32 %v645_v35, %v2688_v40  ;;  %v608_v2 = vadd.f32 %v607_v51, %v606_v31  ;;  %v334_v35 = vpop.f32.mrf.mxu0 }
 0x14e   :  { %v657_v24 = vadd.f32 %v656_v52, %v655_v32  ;;  %v662_v23 = vadd.f32 %v661_v19, %v660_v33  ;;  %v589_v39 = vadd.f32 %v588_v30, %v2721_v50  ;;  %v615_v36 = vadd.f32 %v614_v43, %v613_v54 }
 0x14f   :  { %v720_v59 = vsel %vm186_vm3, %v684_v56, 0.0  ;;  %v696_v49 = vsel %vm186_vm3, %v676_v57, 0.0  ;;  %v667_v16 = vsel %vm186_vm3, %v561_v10, 0.0  ;;  %v651_v28 = vrot.slane %v650_v48, 1 }
 0x150   :  { %v663_v4 = vrot.slane %v662_v23, 2  ;;  %721 = vadd.xlane.f32.xlu1 %v720_v59  ;;  %697 = vadd.xlane.f32.xlu0 %v696_v49  ;;  %v668_v25 = vrot.slane %v667_v16, 4  ;;  %v677_v60 = vmul.f32 %v589_v39, %v2656_v9  ;;  %v723_v40 = vsel %vm186_vm3, %v685_v34, 0.0 }
 0x151   :  { %v595_v31 = vrot.slane %v594_v27, 1  ;;  %v658_v18 = vrot.slane %v657_v24, 1  ;;  %v602_v1 = vrot.slane %v601_v53, 1  ;;  %v652_v21 = vadd.f32 %v651_v28, %v650_v48 }
 0x152   :  { %v664_v50 = vadd.f32 %v663_v4, %v662_v23  ;;  %v669_v63 = vadd.f32 %v668_v25, %v667_v16  ;;  %v609_v22 = vrot.slane %v608_v2, 1  ;;  %v699_v15 = vsel %vm186_vm3, %v677_v60, 0.0 }
 0x153   :  { %v596_v3 = vadd.f32 %v595_v31, %v594_v27  ;;  %v659_v11 = vadd.f32 %v658_v18, %v657_v24  ;;  %v603_v14 = vadd.f32 %v602_v1, %v601_v53  ;;  %v686_v9 = vmul.f32 %v652_v21, %v2696_v8 }
 0x154   :  { %v670_v55 = vrot.slane %v669_v63, 2  ;;  %724 = vadd.xlane.f32.xlu1 %v723_v40  ;;  %700 = vadd.xlane.f32.xlu0 %v699_v15  ;;  %v665_v42 = vrot.slane %v664_v50, 1  ;;  %v285_v46 = vadd.f32 %v2622_v13, %v2639_v37  ;;  %v331_v48 = vadd.f32 %v2693_v29, %v2639_v37 }
 0x155   :  { %v678_v51 = vmul.f32 %v596_v3, %v2660_v62  ;;  %v687_v54 = vmul.f32 %v659_v11, %v2704_v47  ;;  %v726_v27 = vsel %vm186_vm3, %v686_v9, 0.0  ;;  %v610_v58 = vadd.f32 %v609_v22, %v608_v2 }
 0x156   :  { %v671_v32 = vadd.f32 %v670_v55, %v669_v63  ;;  %v666_v53 = vadd.f32 %v665_v42, %v664_v50  ;;  %v679_v26 = vmul.f32 %v603_v14, %v285_v46  ;;  %v616_v8 = vrot.slane %v615_v36, 1 }
 0x157   :  { %v702_v33 = vsel %vm186_vm3, %v678_v51, 0.0  ;;  %v291_v62 = vadd.f32 %v2624_v17, %v2639_v37  ;;  %v729_v47 = vsel %vm186_vm3, %v687_v54, 0.0  ;;  %v335_v52 = vadd.f32 %v334_v35, %v2639_v37 }
 0x158   :  { %727 = vadd.xlane.f32.xlu1 %v726_v27  ;;  %703 = vadd.xlane.f32.xlu0 %v702_v33  ;;  %v672_v13 = vrot.slane %v671_v32, 1  ;;  %v688_v43 = vmul.f32 %v666_v53, %v331_v48  ;;  %v705_v19 = vsel %vm186_vm3, %v679_v26, 0.0  ;;  %v617_v30 = vadd.f32 %v616_v8, %v615_v36 }
 0x159   :  { %v680_v7 = vmul.f32 %v610_v58, %v291_v62  ;;  %v295_v56 = vadd.f32 %v2626_v20, %v2639_v37  ;;  %v756_v60 = vsub.s32 %v2570_v0, %v2568_v61  ;;  %v3109_v0 = vld [vmem:[#allocation23_spill] sm:$0xff] }
 0x15a   :  { %v673_v29 = vadd.f32 %v672_v13, %v671_v32  ;;  %v732_v57 = vsel %vm186_vm3, %v688_v43, 0.0  ;;  %v1198_v6 = vrot.slane %v3109_v0, 2 }
 0x15b   :  { %v708_v17 = vsel %vm186_vm3, %v680_v7, 0.0  ;;  %v681_v34 = vmul.f32 %v617_v30, %v295_v56 }
 0x15c   :  { %730 = vadd.xlane.f32.xlu1 %v729_v47  ;;  %706 = vadd.xlane.f32.xlu0 %v705_v19  ;;  %v689_v10 = vmul.f32 %v673_v29, %v335_v52 }
 0x15d   :  { %v711_v24 = vsel %vm186_vm3, %v681_v34, 0.0  ;;  %v2279_v34 = vld [vmem:[#allocation5 + $0x70] ss:$52 sps:$4 sm:$0xff]  }
 0x15e   :  { %v735_v2 = vsel %vm186_vm3, %v689_v10, 0.0  ;;  %v2278_v10 = vld [vmem:[#allocation5 + $0xd8] ss:$52 sps:$4 sm:$0xff]  }
 0x160   :  { %733 = vadd.xlane.f32.xlu1 %v732_v57  ;;  %709 = vadd.xlane.f32.xlu0 %v708_v17  ;;  %v222_v17 = vand.u32 %v2278_v10, %v2482_v5 }
 0x162   :  { %2143 = vmatprep.subr.bf16.mxu1 %v222_v17 }
 0x163   :  { %2144 = vmatpush3.bf16.msra.mxu1 %v222_v17 }
 0x164   :  { %736 = vadd.xlane.f32.xlu1 %v735_v2  ;;  %712 = vadd.xlane.f32.xlu0 %v711_v24  ;;  %v2280_v2 = vld [vmem:[#allocation5 + $0x8] ss:$52 sps:$4 sm:$0xff]   ;;  %v3098_v24 = vmov 0.0  }
 0x165   :  { %2145 = vmatprep.subr.bf16.mxu1 %v2279_v34 }
 0x167   :  { %2146 = vmatpush3.bf16.msra.mxu1 %v2279_v34  ;;  %v3116_v34 = vld [vmem:[#allocation32_spill] sm:$0xff] }
 0x168   :  { %2147 = vmatprep.subr.bf16.mxu1 %v2280_v2 }
 0x16b   :  { %2148 = vmatpush3.bf16.msra.mxu1 %v2280_v2 }
 0x16c   :  { %2165 = vmatprep.subr.bf16.mxu1 %v3098_v24 }
 0x16e   :  { %2150 = vmatmul.mubr.msk.bf16.vlgmr.msra.gmra.mxu1 %vm186_vm3, %v2504_v38 }
 0x16f   :  { %2153 = vmatprep.mubr.msk.bf16.mxu1 %vm186_vm3, %v2515_v41 }
 0x176   :  { %2154 = vmatmul.mubr.msk.bf16.gmra.mxu1 %vm186_vm3, %v2526_v44 }
 0x177   :  { %2157 = vmatprep.mubr.msk.bf16.mxu1 %vm186_vm3, %v2531_v45 }
 0x1c9   :  { %v692_v23 = vpop.xlane.xlu0 %691  ;;  %v695_v36 = vpop.xlane.xlu1 %694 }
 0x1ca   :  { %v761_v31 = vrot.slane %v695_v36, %v756_v60  ;;  %v757_v18 = vrot.slane %v692_v23, %v756_v60  ;;  %v3099_v23 = vld [vmem:[#allocation21_spill] sm:$0xff]  ;;  %v3101_v36 = vld [vmem:[#allocation27_spill] sm:$0xff] }
 0x1cb   :  { %2158 = vmatmul.mubr.msk.bf16.gmra.mxu1 %vm186_vm3, %v3099_v23 }
 0x1cc   :  { %v819_v61 = vsel %vm818_vm4, %v761_v31, %v757_v18  ;;  %v3103_v31 = vld [vmem:[#allocation19_spill] sm:$0xff] }
 0x1cd   :  { %v1192_v18 = vrot.slane %v3103_v31, 5 }
 0x1d1   :  { %v716_v39 = vpop.xlane.xlu0 %715 }
 0x1d2   :  { %v789_v21 = vrot.slane %v716_v39, %v756_v60  ;;  %v3100_v39 = vld [vmem:[#allocation24_spill] sm:$0xff] }
 0x1d3   :  { %2161 = vmatprep.mubr.msk.bf16.mxu1 %vm186_vm3, %v3100_v39  ;;  %v3117_v39 = vld [vmem:[#allocation33_spill] sm:$0xff] }
 0x1d4   :  { %2162 = vmatmul.mubr.msk.bf16.gmra.mxu1 %vm186_vm3, %v3101_v36 }
 0x1d5   :  { %v719_v59 = vpop.xlane.xlu0 %718 }
 0x1d6   :  { %v793_v1 = vrot.slane %v719_v59, %v756_v60 }
 0x1d8   :  { %v832_v9 = vsel %vm818_vm4, %v793_v1, %v789_v21  ;;  %v3104_v1 = vld [vmem:[#allocation14_spill] sm:$0xff] }
 0x1d9   :  { %v722_v49 = vpop.xlane.xlu1 %721  ;;  %v698_v37 = vpop.xlane.xlu0 %697 }
 0x1da   :  { %v797_v50 = vrot.slane %v722_v49, %v756_v60  ;;  %v765_v63 = vrot.slane %v698_v37, %v756_v60 }
 0x1dc   :  { %v833_v51 = vsel %vm820_vm7, %v797_v50, %v832_v9  ;;  %v821_v54 = vsel %vm820_vm7, %v765_v63, %v819_v61  ;;  %v1180_v50 = vrot.slane %v3104_v1, 4  ;;  %v3105_v63 = vld [vmem:[#allocation20_spill] sm:$0xff]  ;;  %v3123_v1 = vld [vmem:[#allocation26_spill] sm:$0xff] }
 0x1dd   :  { %v725_v20 = vpop.xlane.xlu1 %724  ;;  %v701_v16 = vpop.xlane.xlu0 %700  ;;  %v1194_v21 = vrot.slane %v3105_v63, 4  ;;  %v3111_v9 = vld [vmem:[#allocation12_spill] sm:$0xff] }
 0x1de   :  { %v801_v22 = vrot.slane %v725_v20, %v756_v60  ;;  %v769_v15 = vrot.slane %v701_v16, %v756_v60  ;;  %v2281_v63 = vld [vmem:[#allocation5 + $0x214] ss:$52 sps:$4 sm:$0x7f]  }
 0x1e0   :  { %v834_v27 = vsel %vm822_vm8, %v801_v22, %v833_v51  ;;  %v823_v53 = vsel %vm822_vm8, %v769_v15, %v821_v54  ;;  %v1182_v22 = vrot.slane %v3106_v12, 3  ;;  %v3107_v15 = vld [vmem:[#allocation22_spill] sm:$0xff]  ;;  %v2282_v12 = vld [vmem:[#allocation5 + $0x1ac] ss:$52 sps:$4 sm:$0xff]  }
 0x1e1   :  { %v728_v4 = vpop.xlane.xlu1 %727  ;;  %v704_v25 = vpop.xlane.xlu0 %703 }
 0x1e2   :  { %v805_v3 = vrot.slane %v728_v4, %v756_v60  ;;  %v773_v11 = vrot.slane %v704_v25, %v756_v60 }
 0x1e4   :  { %v835_v33 = vsel %vm824_vm9, %v805_v3, %v834_v27  ;;  %v825_v26 = vsel %vm824_vm9, %v773_v11, %v823_v53  ;;  %v1196_v3 = vrot.slane %v3107_v15, 3  ;;  %v3108_v11 = vld [vmem:[#allocation16_spill] sm:$0xff]  ;;  %v2284_v15 = vld [vmem:[#allocation5 + $0xdc] ss:$52 sps:$4 sm:$0xff]  }
 0x1e5   :  { %v731_v28 = vpop.xlane.xlu1 %730  ;;  %v707_v40 = vpop.xlane.xlu0 %706 }
 0x1e6   :  { %v809_v42 = vrot.slane %v731_v28, %v756_v60  ;;  %v777_v46 = vrot.slane %v707_v40, %v756_v60  ;;  %v3102_v28 = vld [vmem:[#allocation13_spill] sm:$0xff] }
 0x1e7   :  { %v1178_v40 = vrot.slane %v3102_v28, 5  ;;  %v3122_v28 = vld [vmem:[#allocation25_spill] sm:$0xff] }
 0x1e8   :  { %v836_v35 = vsel %vm826_vm10, %v809_v42, %v835_v33  ;;  %v827_v13 = vsel %vm826_vm10, %v777_v46, %v825_v26  ;;  %v1193_v42 = vsel %vm820_vm7, %v1192_v18, %v3111_v9 }
 0x1e9   :  { %v734_v14 = vpop.xlane.xlu1 %733  ;;  %v710_v55 = vpop.xlane.xlu0 %709  ;;  %v1195_v51 = vsel %vm822_vm8, %v1194_v21, %v1193_v42  ;;  %v1271_v21 = vsel %vm211_vm0, %v2281_v63, 0 }
 0x1ea   :  { %v813_v48 = vrot.slane %v734_v14, %v756_v60  ;;  %v781_v32 = vrot.slane %v710_v55, %v756_v60  ;;  %v1184_v14 = vrot.slane %v3108_v11, 2  ;;  %v3110_v55 = vld [vmem:[#allocation11_spill] sm:$0xff]  ;;  %2166 = vmatpush3.bf16.msra.mxu1 %v1271_v21 }
 0x1eb   :  { %v1179_v61 = vsel %vm820_vm7, %v1178_v40, %v3110_v55  ;;  %v1200_v40 = vrot.slane %v3122_v28, 1  ;;  %2167 = vmatprep.subr.bf16.mxu1 %v3098_v24  ;;  %v2286_v11 = vld [vmem:[#allocation5 + $0xc] ss:$52 sps:$4 sm:$0xff]  }
 0x1ec   :  { %v837_v43 = vsel %vm828_vm11, %v813_v48, %v836_v35  ;;  %v829_v29 = vsel %vm828_vm11, %v781_v32, %v827_v13  ;;  %v1181_v46 = vsel %vm822_vm8, %v1180_v50, %v1179_v61  ;;  %v1197_v48 = vsel %vm824_vm9, %v1196_v3, %v1195_v51  ;;  %v2285_v3 = vld [vmem:[#allocation5 + $0x74] ss:$52 sps:$4 sm:$0xff]  }
 0x1ed   :  { %v737_v58 = vpop.xlane.xlu1 %736  ;;  %v713_v8 = vpop.xlane.xlu0 %712  ;;  %v1183_v54 = vsel %vm824_vm9, %v1182_v22, %v1181_v46  ;;  %v1199_v27 = vsel %vm826_vm10, %v1198_v6, %v1197_v48  ;;  %v2283_v22 = vld [vmem:[#allocation5 + $0x144] ss:$52 sps:$4 sm:$0xff]  }
 0x1ee   :  { %v817_v62 = vrot.slane %v737_v58, %v756_v60  ;;  %v785_v47 = vrot.slane %v713_v8, %v756_v60  ;;  %v1185_v32 = vsel %vm826_vm10, %v1184_v14, %v1183_v54  ;;  %v1201_v18 = vsel %vm828_vm11, %v1200_v40, %v1199_v27  ;;  %2168 = vmatpush3.bf16.msra.mxu1 %v2282_v12  ;;  %v3124_v54 = vld [vmem:[#allocation36_spill] sm:$0xff] }
 0x1ef   :  { %v1202_v50 = vsel %vm830_vm12, %v3123_v1, %v1201_v18  ;;  %2169 = vmatprep.subr.bf16.mxu1 %v3098_v24 }
 0x1f0   :  { %v838_v52 = vsel %vm830_vm12, %v817_v62, %v837_v43  ;;  %v831_v19 = vsel %vm830_vm12, %v785_v47, %v829_v29  ;;  %v3112_v47 = vld [vmem:[#allocation28_spill] sm:$0xff]  ;;  %v3113_v29 = vld [vmem:[#allocation29_spill] sm:$0xff] }
 0x1f1   :  { %v842_v7 = vsel %vm103_vm13, %v838_v52, -1e+30  ;;  %v841_v30 = vsel %vm102_vm14, %v831_v19, -1e+30 }
 0x1f2   :  { %v846_v56 = vsel %vm65_vm2, %v842_v7, -inf  ;;  %v843_v57 = vsel %vm65_vm2, %v841_v30, -inf  ;;  %2170 = vmatpush3.bf16.msra.mxu1 %v2283_v22 }
 0x1f3   :  { %847 = vmax.xlane.f32.xlu1 %v846_v56  ;;  %844 = vmax.xlane.f32.xlu0 %v843_v57  ;;  %v3115_v57 = vld [vmem:[#allocation31_spill] sm:$0xff] }
 0x1f4   :  { %2171 = vmatprep.subr.bf16.mxu1 %v3098_v24 }
 0x1f6   :  { %2172 = vmatpush3.bf16.msra.mxu1 %v2284_v15 }
 0x1f7   :  { %2173 = vmatprep.subr.bf16.mxu1 %v3098_v24 }
 0x1fa   :  { %2174 = vmatpush3.bf16.msra.mxu1 %v2285_v3 }
 0x1fb   :  { %2175 = vmatprep.subr.bf16.mxu1 %v3098_v24 }
 0x1fe   :  { %2176 = vmatpush3.bf16.msra.mxu1 %v2286_v11 }
 0x1ff   :  { %2181 = vmatprep.subr.bf16.mxu1 %v3098_v24 }
 0x22e   :  { %v2151_v14 = vpop.f32.mrf.mxu1 }
 0x230   :  { %v371_v0 = vpop.f32.mrf.mxu1 }
 0x232   :  { %v2152_v6 = vpop.f32.mrf.mxu1 }
 0x234   :  { %v374_v55 = vpop.f32.mrf.mxu1 }
 0x236   :  { %v2874_v61 = vpop.f32.mrf.mxu1 }
 0x238   :  { %v387_v9 = vpop.f32.mrf.mxu1 }
 0x23a   :  { %v2876_v42 = vpop.f32.mrf.mxu1 }
 0x23c   :  { %v2878_v46 = vpop.f32.mrf.mxu1 }
 0x27c   :  { %v848_v59 = vpop.xlane.xlu1 %847  ;;  %v845_v38 = vpop.xlane.xlu0 %844 }
 0x27d   :  { %v850_v49 = vsub.f32 %v842_v7, %v848_v59  ;;  %v849_v37 = vsub.f32 %v841_v30, %v845_v38  ;;  %v3114_v7 = vld [vmem:[#allocation30_spill] sm:$0xff] }
 0x27e   :  { %v3118_v38 = vld [vmem:[#allocation34_spill] sm:$0xff]  ;;  %v2882_v48 = vrot.slane %v3124_v54, %v3114_v7 }
 0x27f   :  { %v853_v41 = vmul.f32 1.442695, %v850_v49  ;;  %v851_v20 = vmul.f32 1.442695, %v849_v37  ;;  %v3119_v37 = vld [vmem:[#allocation17_spill] sm:$0xff] }
 0x280   :  { %v372_v27 = vadd.f32 %v371_v0, %v2882_v48  ;;  %v388_v28 = vadd.f32 %v387_v9, %v2882_v48 }
 0x281   :  { %2305 = vpow2.f32 %v853_v41  ;;  %v1186_v41 = vrot.slane %v3119_v37, 1 }
 0x282   :  { %2307 = vpow2.f32 %v851_v20 }
 0x28b   :  { %v2159_v51 = vpop.f32.mrf.mxu1 }
 0x28e   :  { %v2306_v44 = vpop.eup %2305 }
 0x28f   :  { %v2308_v16 = vpop.eup %2307  ;;  %v856_v45 = vsel %vm103_vm13, %v2306_v44, 0.0  ;;  %v3120_v44 = vld [vmem:[#allocation35_spill] sm:$0xff] }
 0x290   :  { %v860_v4 = vsel %vm65_vm2, %v856_v45, 0.0  ;;  %v855_v25 = vsel %vm102_vm14, %v2308_v16, 0.0 }
 0x291   :  { %861 = vadd.xlane.f32.xlu1 %v860_v4  ;;  %v857_v60 = vsel %vm65_vm2, %v855_v25, 0.0  ;;  %v3121_v4 = vld [vmem:[#allocation18_spill] sm:$0xff]  ;;  %vm2437_vm2 = vmmov 0  }
 0x292   :  { %858 = vadd.xlane.f32.xlu0 %v857_v60  ;;  %2177 = vmatprep.mubr.msk.bf16.mxu1 %vm2437_vm2, %v3098_v24 }
 0x293   :  { %2205 = vmatprep.mubr.msk.bf16.mxu0 %vm2437_vm2, %v3098_v24 }
 0x31a   :  { %v862_v53 = vpop.xlane.xlu1 %861 }
 0x31b   :  { %2309 = vrcp.f32 %v862_v53  ;;  %v859_v33 = vpop.xlane.xlu0 %858  ;;  %vm864_vm15 = vcmp.gt.f32.partialorder %v862_v53, 0.0  ;;  %v375_v53 = vadd.f32 %v374_v55, %v2882_v48 }
 0x31c   :  { %2311 = vrcp.f32 %v859_v33  ;;  %vm863_vm1 = vcmp.gt.f32.partialorder %v859_v33, 0.0 }
 0x328   :  { %v2310_v26 = vpop.eup %2309 }
 0x329   :  { %v2312_v58 = vpop.eup %2311  ;;  %v868_v8 = vsel %vm864_vm15, %v2310_v26, 0.0 }
 0x32a   :  { %v867_v35 = vsel %vm863_vm1, %v2312_v58, 0.0  ;;  %v870_v62 = vmul.f32 %v868_v8, %v856_v45  ;;  %v1187_v45 = vsel %vm828_vm11, %v1186_v41, %v1185_v32  ;;  %v403_v32 = vpop.f32.mrf.mxu1 }
 0x32b   :  { %v869_v13 = vmul.f32 %v867_v35, %v855_v25  ;;  %v1188_v25 = vsel %vm830_vm12, %v3121_v4, %v1187_v45 }
 0x32c   :  { %v930_v19 = vrot.slane %v870_v62, %v3113_v29  ;;  %v937_v56 = vrot.slane %v870_v62, %v3112_v47  ;;  %v944_v17 = vrot.slane %v870_v62, %v3114_v7  ;;  %v951_v23 = vrot.slane %v870_v62, %v3115_v57  ;;  %v2160_v33 = vpop.f32.mrf.mxu1 }
 0x32d   :  { %v881_v43 = vrot.slane %v869_v13, %v3112_v47  ;;  %v874_v52 = vrot.slane %v869_v13, %v3113_v29  ;;  %v888_v30 = vrot.slane %v869_v13, %v3114_v7  ;;  %v895_v10 = vrot.slane %v869_v13, %v3115_v57 }
 0x32e   :  { %v902_v2 = vrot.slane %v869_v13, %v3116_v34  ;;  %v909_v36 = vrot.slane %v869_v13, %v3117_v39  ;;  %v958_v59 = vrot.slane %v870_v62, %v3116_v34  ;;  %v916_v49 = vrot.slane %v869_v13, %v3118_v38 }
 0x32f   :  { %883 = vbcast.lane.b32.xlu1 %v881_v43, 256  ;;  %876 = vbcast.lane.b32.xlu0 %v874_v52, 256  ;;  %v965_v20 = vrot.slane %v870_v62, %v3117_v39  ;;  %v923_v16 = vrot.slane %v869_v13, %v3120_v44  ;;  %v972_v60 = vrot.slane %v870_v62, %v3118_v38 }
 0x330   :  { %v979_v31 = vrot.slane %v870_v62, %v3120_v44  ;;  %v404_v13 = vadd.f32 %v403_v32, %v2882_v48  ;;  %v406_v62 = vpop.f32.mrf.mxu1  ;;  %v380_v47 = vadd.f32 %v2151_v14, %v2882_v48  ;;  %v412_v44 = vadd.f32 %v2159_v51, %v2882_v48 }
 0x331   :  { %v415_v0 = vadd.f32 %v2160_v33, %v2882_v48 }
 0x333   :  { %932 = vbcast.lane.b32.xlu1 %v930_v19, 256  ;;  %890 = vbcast.lane.b32.xlu0 %v888_v30, 256 }
 0x337   :  { %939 = vbcast.lane.b32.xlu1 %v937_v56, 256  ;;  %897 = vbcast.lane.b32.xlu0 %v895_v10, 256  ;;  %v407_v10 = vadd.f32 %v406_v62, %v2882_v48 }
 0x33b   :  { %946 = vbcast.lane.b32.xlu1 %v944_v17, 256  ;;  %904 = vbcast.lane.b32.xlu0 %v902_v2, 256  ;;  %v383_v2 = vadd.f32 %v2152_v6, %v2882_v48 }
 0x33f   :  { %953 = vbcast.lane.b32.xlu1 %v951_v23, 256  ;;  %911 = vbcast.lane.b32.xlu0 %v909_v36, 256  ;;  %v2163_v36 = vpop.f32.mrf.mxu1 }
 0x341   :  { %v419_v1 = vpop.f32.mrf.mxu1 }
 0x343   :  { %960 = vbcast.lane.b32.xlu1 %v958_v59, 256  ;;  %918 = vbcast.lane.b32.xlu0 %v916_v49, 256 }
 0x347   :  { %967 = vbcast.lane.b32.xlu1 %v965_v20, 256  ;;  %925 = vbcast.lane.b32.xlu0 %v923_v16, 256 }
 0x34b   :  { %974 = vbcast.lane.b32.xlu1 %v972_v60, 256  ;;  %1203 = vrot.lane.b32.xlu0 %v1188_v25, %s2436_s6 }
 0x34f   :  { %981 = vbcast.lane.b32.xlu1 %v979_v31, 256 }
 0x353   :  { %1205 = vrot.lane.b32.xlu1 %v1202_v50, %s2436_s6 }
 0x3a1   :  { %v884_v26 = vpop.permute.xlu1 %883  ;;  %v877_v58 = vpop.permute.xlu0 %876 }
 0x3a2   :  { %v984_v8 = vmul.f32 %v884_v26, %v375_v53  ;;  %v983_v35 = vmul.f32 %v877_v58, %v372_v27  ;;  %v2164_v27 = vpop.f32.mrf.mxu1  ;;  %v396_v53 = vadd.f32 %v2874_v61, %v2882_v48  ;;  %v391_v26 = vadd.f32 %v2878_v46, %v2882_v48 }
 0x3a4   :  { %v1006_v43 = vsel %vm186_vm3, %v984_v8, 0.0  ;;  %v999_v29 = vsel %vm186_vm3, %v983_v35, 0.0  ;;  %v422_v46 = vpop.f32.mrf.mxu1 }
 0x3a5   :  { %v1007_v52 = vrot.slane %v1006_v43, 4  ;;  %v1000_v19 = vrot.slane %v999_v29, 4  ;;  %v933_v7 = vpop.permute.xlu1 %932  ;;  %v891_v30 = vpop.permute.xlu0 %890 }
 0x3a6   :  { %v991_v56 = vmul.f32 %v933_v7, %v404_v13  ;;  %v985_v57 = vmul.f32 %v891_v30, %v380_v47  ;;  %v420_v7 = vadd.f32 %v419_v1, %v2882_v48  ;;  %v399_v30 = vadd.f32 %v2876_v42, %v2882_v48 }
 0x3a7   :  { %v1008_v17 = vadd.f32 %v1007_v52, %v1006_v43  ;;  %v1001_v34 = vadd.f32 %v1000_v19, %v999_v29 }
 0x3a8   :  { %v1055_v23 = vsel %vm186_vm3, %v991_v56, 0.0  ;;  %v1013_v39 = vsel %vm186_vm3, %v985_v57, 0.0 }
 0x3a9   :  { %v1009_v59 = vrot.slane %v1008_v17, 2  ;;  %v1002_v38 = vrot.slane %v1001_v34, 2  ;;  %v1056_v49 = vrot.slane %v1055_v23, 4  ;;  %v1014_v37 = vrot.slane %v1013_v39, 4  ;;  %v940_v41 = vpop.permute.xlu1 %939  ;;  %v898_v20 = vpop.permute.xlu0 %897 }
 0x3aa   :  { %v992_v16 = vmul.f32 %v940_v41, %v407_v10  ;;  %v986_v45 = vmul.f32 %v898_v20, %v383_v2  ;;  %v2911_v2 = vadd.f32 %v2164_v27, %v2882_v48 }
 0x3ab   :  { %v1010_v4 = vadd.f32 %v1009_v59, %v1008_v17  ;;  %v1057_v25 = vadd.f32 %v1056_v49, %v1055_v23  ;;  %v1015_v60 = vadd.f32 %v1014_v37, %v1013_v39  ;;  %v1003_v40 = vadd.f32 %v1002_v38, %v1001_v34 }
 0x3ac   :  { %v1062_v31 = vsel %vm186_vm3, %v992_v16, 0.0  ;;  %v1020_v18 = vsel %vm186_vm3, %v986_v45, 0.0  ;;  %v428_v17 = vadd.f32 %v2163_v36, %v2882_v48  ;;  %v423_v36 = vadd.f32 %v422_v46, %v2882_v48 }
 0x3ad   :  { %v1011_v50 = vrot.slane %v1010_v4, 1  ;;  %v1058_v63 = vrot.slane %v1057_v25, 2  ;;  %v1016_v21 = vrot.slane %v1015_v60, 2  ;;  %v947_v12 = vpop.permute.xlu1 %946  ;;  %v905_v22 = vpop.permute.xlu0 %904  ;;  %v1063_v15 = vrot.slane %v1062_v31, 4 }
 0x3ae   :  { %v1021_v3 = vrot.slane %v1020_v18, 4  ;;  %v993_v11 = vmul.f32 %v947_v12, %v412_v44  ;;  %v987_v14 = vmul.f32 %v905_v22, %v388_v28  ;;  %v1004_v9 = vrot.slane %v1003_v40, 1 }
 0x3af   :  { %v1059_v6 = vadd.f32 %v1058_v63, %v1057_v25  ;;  %v1017_v55 = vadd.f32 %v1016_v21, %v1015_v60  ;;  %v1064_v51 = vadd.f32 %v1063_v15, %v1062_v31  ;;  %v1012_v33 = vadd.f32 %v1011_v50, %v1010_v4 }
 0x3b0   :  { %v1069_v54 = vsel %vm186_vm3, %v993_v11, 0.0  ;;  %v1027_v32 = vsel %vm186_vm3, %v987_v14, 0.0  ;;  %v1022_v58 = vadd.f32 %v1021_v3, %v1020_v18  ;;  %v1005_v61 = vadd.f32 %v1004_v9, %v1003_v40 }
 0x3b1   :  { %v1070_v8 = vrot.slane %v1069_v54, 4  ;;  %v954_v35 = vpop.permute.xlu1 %953  ;;  %v912_v13 = vpop.permute.xlu0 %911  ;;  %v1060_v62 = vrot.slane %v1059_v6, 1  ;;  %v1018_v47 = vrot.slane %v1017_v55, 1  ;;  %v1028_v43 = vrot.slane %v1027_v32, 4 }
 0x3b2   :  { %v1065_v29 = vrot.slane %v1064_v51, 2  ;;  %v994_v19 = vmul.f32 %v954_v35, %v415_v0  ;;  %v988_v57 = vmul.f32 %v912_v13, %v391_v26  ;;  %v1023_v10 = vrot.slane %v1022_v58, 2 }
 0x3b3   :  { %v1071_v52 = vadd.f32 %v1070_v8, %v1069_v54  ;;  %v1029_v56 = vadd.f32 %v1028_v43, %v1027_v32  ;;  %2313 = vtanh.f32 %v1012_v33  ;;  %v1061_v59 = vadd.f32 %v1060_v62, %v1059_v6 }
 0x3b4   :  { %v1076_v34 = vsel %vm186_vm3, %v994_v19, 0.0  ;;  %v1019_v38 = vadd.f32 %v1018_v47, %v1017_v55  ;;  %v1066_v37 = vadd.f32 %v1065_v29, %v1064_v51  ;;  %v1034_v41 = vsel %vm186_vm3, %v988_v57, 0.0 }
 0x3b5   :  { %v961_v23 = vpop.permute.xlu1 %960  ;;  %v919_v39 = vpop.permute.xlu0 %918  ;;  %v1072_v49 = vrot.slane %v1071_v52, 2  ;;  %v1077_v42 = vrot.slane %v1076_v34, 4  ;;  %2315 = vtanh.f32 %v1005_v61  ;;  %v1030_v44 = vrot.slane %v1029_v56, 2 }
 0x3b6   :  { %v995_v20 = vmul.f32 %v961_v23, %v420_v7  ;;  %v1035_v16 = vrot.slane %v1034_v41, 4  ;;  %v1024_v45 = vadd.f32 %v1023_v10, %v1022_v58  ;;  %v989_v60 = vmul.f32 %v919_v39, %v396_v53 }
 0x3b7   :  { %v1078_v4 = vadd.f32 %v1077_v42, %v1076_v34  ;;  %2317 = vtanh.f32 %v1061_v59  ;;  %v1073_v40 = vadd.f32 %v1072_v49, %v1071_v52  ;;  %v1067_v50 = vrot.slane %v1066_v37, 1 }
 0x3b8   :  { %v1083_v25 = vsel %vm186_vm3, %v995_v20, 0.0  ;;  %v1036_v31 = vadd.f32 %v1035_v16, %v1034_v41  ;;  %2319 = vtanh.f32 %v1019_v38  ;;  %v1041_v21 = vsel %vm186_vm3, %v989_v60, 0.0 }
 0x3b9   :  { %v968_v28 = vpop.permute.xlu1 %967  ;;  %v1084_v18 = vrot.slane %v1083_v25, 4  ;;  %v926_v1 = vpop.permute.xlu0 %925  ;;  %v1079_v63 = vrot.slane %v1078_v4, 2  ;;  %v1031_v12 = vadd.f32 %v1030_v44, %v1029_v56  ;;  %v1042_v48 = vrot.slane %v1041_v21, 4 }
 0x3ba   :  { %v1037_v22 = vrot.slane %v1036_v31, 2  ;;  %v1025_v3 = vrot.slane %v1024_v45, 1  ;;  %v996_v14 = vmul.f32 %v968_v28, %v423_v36  ;;  %v990_v0 = vmul.f32 %v926_v1, %v399_v30 }
 0x3bb   :  { %v1085_v15 = vadd.f32 %v1084_v18, %v1083_v25  ;;  %v1080_v11 = vadd.f32 %v1079_v63, %v1078_v4  ;;  %v1074_v55 = vrot.slane %v1073_v40, 1  ;;  %v1043_v54 = vadd.f32 %v1042_v48, %v1041_v21 }
 0x3bc   :  { %v1038_v9 = vadd.f32 %v1037_v22, %v1036_v31  ;;  %v1068_v32 = vadd.f32 %v1067_v50, %v1066_v37  ;;  %v1090_v27 = vsel %vm186_vm3, %v996_v14, 0.0  ;;  %v1048_v53 = vsel %vm186_vm3, %v990_v0, 0.0 }
 0x3bd   :  { %v975_v6 = vpop.permute.xlu1 %974  ;;  %v1086_v51 = vrot.slane %v1085_v15, 2  ;;  %v1032_v58 = vrot.slane %v1031_v12, 1  ;;  %v1044_v35 = vrot.slane %v1043_v54, 2  ;;  %v1091_v13 = vrot.slane %v1090_v27, 4 }
 0x3be   :  { %v997_v26 = vmul.f32 %v975_v6, %v428_v17  ;;  %v1026_v33 = vadd.f32 %v1025_v3, %v1024_v45  ;;  %v1081_v62 = vrot.slane %v1080_v11, 1  ;;  %v1049_v47 = vrot.slane %v1048_v53, 4 }
 0x3bf   :  { %v1087_v8 = vadd.f32 %v1086_v51, %v1085_v15  ;;  %v1075_v52 = vadd.f32 %v1074_v55, %v1073_v40  ;;  %v1039_v19 = vrot.slane %v1038_v9, 1  ;;  %v1045_v7 = vadd.f32 %v1044_v35, %v1043_v54 }
 0x3c0   :  { %v1097_v43 = vsel %vm186_vm3, %v997_v26, 0.0  ;;  %v1092_v30 = vadd.f32 %v1091_v13, %v1090_v27  ;;  %v2314_v61 = vpop.eup %2313  ;;  %v1050_v57 = vadd.f32 %v1049_v47, %v1048_v53  ;;  %2321 = vtanh.f32 %v1068_v32 }
 0x3c1   :  { %v982_v29 = vpop.permute.xlu1 %981  ;;  %v1088_v56 = vrot.slane %v1087_v8, 1  ;;  %v1098_v46 = vrot.slane %v1097_v43, 4  ;;  %v1033_v17 = vadd.f32 %v1032_v58, %v1031_v12  ;;  %v1046_v34 = vrot.slane %v1045_v7, 1 }
 0x3c2   :  { %v998_v10 = vmul.f32 %v982_v29, %v2911_v2  ;;  %v1093_v23 = vrot.slane %v1092_v30, 2  ;;  %v2316_v39 = vpop.eup %2315  ;;  %v1082_v59 = vadd.f32 %v1081_v62, %v1080_v11  ;;  %v1051_v38 = vrot.slane %v1050_v57, 2 }
 0x3c3   :  { %v1099_v49 = vadd.f32 %v1098_v46, %v1097_v43  ;;  %2323 = vtanh.f32 %v1026_v33  ;;  %v1040_v42 = vadd.f32 %v1039_v19, %v1038_v9  ;;  %v1089_v16 = vadd.f32 %v1088_v56, %v1087_v8  ;;  %v1204_v43 = vpop.permute.xlu0 %1203  ;;  %v1316_v46 = vld [vmem:[#allocation5 + $0x10] sm:$0x1] }
 0x3c4   :  { %v1104_v37 = vsel %vm186_vm3, %v998_v10, 0.0  ;;  %v1094_v41 = vadd.f32 %v1093_v23, %v1092_v30  ;;  %v2318_v44 = vpop.eup %2317  ;;  %2325 = vtanh.f32 %v1075_v52  ;;  %v1052_v36 = vadd.f32 %v1051_v38, %v1050_v57 }
 0x3c5   :  { %v1105_v20 = vrot.slane %v1104_v37, 4  ;;  %v1100_v45 = vrot.slane %v1099_v49, 2  ;;  %v2320_v2 = vpop.eup %2319  ;;  %2327 = vtanh.f32 %v1033_v17  ;;  %v1047_v4 = vadd.f32 %v1046_v34, %v1045_v7  ;;  %v1206_v52 = vpop.permute.xlu1 %1205  ;;  %v2050_v17 = vld [vmem:[%s3034_s3 + $0x3] ss:$0 sm:$0xff] }
 0x3c6   :  { %v1095_v25 = vrot.slane %v1094_v41, 1  ;;  %2329 = vtanh.f32 %v1082_v59  ;;  %v1053_v28 = vrot.slane %v1052_v36, 1  ;;  %v1143_v55 = vsel %vm818_vm4, %v2314_v61, %v2316_v39 }
 0x3c7   :  { %v1106_v60 = vadd.f32 %v1105_v20, %v1104_v37  ;;  %v1101_v40 = vadd.f32 %v1100_v45, %v1099_v49  ;;  %2331 = vtanh.f32 %v1040_v42  ;;  %v1144_v51 = vsel %vm820_vm7, %v2320_v2, %v1143_v55  ;;  %v1386_v20 = vld [vmem:[#allocation5 + $0x14] sm:$0x7]  ;;  %v2288_v45 = vld [vmem:[#allocation5 + $0x1b8] ss:$52 sps:$4 sm:$0xff]   ;;  %v2289_v2 = vld [vmem:[#allocation5 + $0x150] ss:$52 sps:$4 sm:$0xff]  }
 0x3c8   :  { %v1096_v31 = vadd.f32 %v1095_v25, %v1094_v41  ;;  %2333 = vtanh.f32 %v1089_v16  ;;  %v1054_v1 = vadd.f32 %v1053_v28, %v1052_v36  ;;  %v1331_v10 = vsel %vm1329_vm5, %v1316_v46, 0  ;;  %v2287_v16 = vld [vmem:[#allocation5 + $0x220] ss:$52 sps:$4 sm:$0x7f]  }
 0x3c9   :  { %v1107_v18 = vrot.slane %v1106_v60, 2  ;;  %v1102_v50 = vrot.slane %v1101_v40, 1  ;;  %2335 = vtanh.f32 %v1047_v4  ;;  %v1505_v36 = vsel %vm211_vm0, %v2287_v16, 0  ;;  %v2290_v4 = vld [vmem:[#allocation5 + $0xe8] ss:$52 sps:$4 sm:$0xff]  }
 0x3ca   :  { %2337 = vtanh.f32 %v1096_v31  ;;  %2194 = vmatpush3.bf16.msra.mxu0 %v1505_v36  ;;  %v2291_v25 = vld [vmem:[#allocation5 + $0x80] ss:$52 sps:$4 sm:$0xff]   ;;  %vm1395_vm0 = vcmask 48128   ;;  %v2299_v36 = vld [vmem:[#allocation5 + $0x8c] ss:$0 sps:$4 sm:$0xff]  }
 0x3cb   :  { %v1108_v63 = vadd.f32 %v1107_v18, %v1106_v60  ;;  %v1103_v21 = vadd.f32 %v1102_v50, %v1101_v40  ;;  %2339 = vtanh.f32 %v1054_v1  ;;  %2195 = vmatprep.subr.bf16.mxu0 %v3098_v24  ;;  %v2058_v60 = vld [vmem:[%s3034_s3 + $0x4] ss:$0 sm:$0xff] }
 0x3cd   :  { %v1109_v12 = vrot.slane %v1108_v63, 1  ;;  %2341 = vtanh.f32 %v1103_v21  ;;  %v2322_v15 = vpop.eup %2321 }
 0x3ce   :  { %v1150_v27 = vsel %vm818_vm4, %v2322_v15, %v2318_v44  ;;  %vm1266_vm4 = vcmask 769024   ;;  %2196 = vmatpush3.bf16.msra.mxu0 %v2288_v45 }
 0x3cf   :  { %v1110_v22 = vadd.f32 %v1109_v12, %v1108_v63  ;;  %2197 = vmatprep.subr.bf16.mxu0 %v3098_v24 }
 0x3d0   :  { %v2324_v48 = vpop.eup %2323 }
 0x3d1   :  { %2343 = vtanh.f32 %v1110_v22  ;;  %v2326_v3 = vpop.eup %2325  ;;  %v1145_v32 = vsel %vm822_vm8, %v2324_v48, %v1144_v51 }
 0x3d2   :  { %v2328_v11 = vpop.eup %2327  ;;  %v1151_v58 = vsel %vm820_vm7, %v2326_v3, %v1150_v27  ;;  %vm1399_vm7 = vcmask 1042432   ;;  %2198 = vmatpush3.bf16.msra.mxu0 %v2289_v2  ;;  %v2300_v2 = vld [vmem:[#allocation5 + $0x24] ss:$52 sps:$4 sm:$0xff]  }
 0x3d3   :  { %v2330_v14 = vpop.eup %2329  ;;  %v1146_v26 = vsel %vm824_vm9, %v2328_v11, %v1145_v32  ;;  %v1401_v44 = vsel %vm1399_vm7, %v1386_v20, 0  ;;  %2199 = vmatprep.subr.bf16.mxu0 %v3098_v24  ;;  %v3125_v20 = vmov 65535  }
 0x3d4   :  { %v2332_v0 = vpop.eup %2331  ;;  %v1152_v13 = vsel %vm822_vm8, %v2330_v14, %v1151_v58  ;;  %vm1734_vm8 = vcmask 1043456  }
 0x3d5   :  { %v2334_v6 = vpop.eup %2333  ;;  %v1147_v35 = vsel %vm826_vm10, %v2332_v0, %v1146_v26  ;;  %v2292_v0 = vld [vmem:[#allocation5 + $0x18] ss:$52 sps:$4 sm:$0xff]  }
 0x3d6   :  { %v2336_v9 = vpop.eup %2335  ;;  %v1153_v62 = vsel %vm824_vm9, %v2334_v6, %v1152_v13  ;;  %2200 = vmatpush3.bf16.msra.mxu0 %v2290_v4  ;;  %v2062_v6 = vld [vmem:[%s3034_s3 + $0x5] ss:$0 sm:$0xff]  ;;  %v2077_v4 = vld [vmem:[%s3034_s3 + $0x8] ss:$0 sm:$0xff]  ;;  %vm1871_vm9 = vcmask 1044480  }
 0x3d7   :  { %v2338_v54 = vpop.eup %2337  ;;  %v1148_v33 = vsel %vm828_vm11, %v2336_v9, %v1147_v35  ;;  %2201 = vmatprep.subr.bf16.mxu0 %v3098_v24  ;;  %v2294_v13 = vld [vmem:[#allocation5 + $0x84] ss:$52 sps:$4 sm:$0xff]  }
 0x3d8   :  { %v2340_v53 = vpop.eup %2339  ;;  %v1154_v29 = vsel %vm826_vm10, %v2338_v54, %v1153_v62  ;;  %v2064_v62 = vld [vmem:[%s3034_s3 + $0x6] ss:$0 sm:$0xff]  ;;  %vm1872_vm10 = vcmask 1045504  }
 0x3d9   :  { %v1149_v47 = vsel %vm830_vm12, %v2340_v53, %v1148_v33  ;;  %v2295_v33 = vld [vmem:[#allocation5 + $0x1c] ss:$52 sps:$4 sm:$0xff]  }
 0x3da   :  { %v2342_v8 = vpop.eup %2341  ;;  %v2937_v61 = vsel %vm186_vm3, %v1149_v47, %v1204_v43  ;;  %2202 = vmatpush3.bf16.msra.mxu0 %v2291_v25 }
 0x3db   :  { %v1155_v7 = vsel %vm828_vm11, %v2342_v8, %v1154_v29  ;;  %2203 = vmatprep.subr.bf16.mxu0 %v3098_v24  ;;  %v2293_v8 = vld [vmem:[#allocation5 + $0xec] ss:$52 sps:$4 sm:$0xff]   ;;  %vm1867_vm11 = vcmask 89088  }
 0x3dc   :  { %v1585_v35 = vand.u32 %v2293_v8, %v2482_v5 }
 0x3de   :  { %v2344_v19 = vpop.eup %2343  ;;  %2204 = vmatpush3.bf16.msra.mxu0 %v2292_v0 }
 0x3df   :  { %v1156_v30 = vsel %vm830_vm12, %v2344_v19, %v1155_v7  ;;  %2229 = vmatprep.subr.bf16.mxu0 %v3098_v24 }
 0x3e0   :  { %v2940_v56 = vsel %vm186_vm3, %v1156_v30, %v1206_v52 }
 0x3e1   :  { %v1224_v57 = vpack.c.bf16 %v2940_v56, %v2937_v61 }
 0x3e3   :  { %2178 = vmatmul.mubr.msk.bf16.vlgmr.msra.gmra.mxu1 %vm1266_vm4, %v1224_v57  ;;  %v2296_v57 = vld [vmem:[#allocation5 + $0xf0] ss:$52 sps:$4 sm:$0xff]  }
 0x3e4   :  { %2183 = vmatprep.mubr.msk.bf16.mxu1 %vm2437_vm2, %v3098_v24  ;;  %2182 = vmatpush3.bf16.msra.mxu1 %v1331_v10  ;;  %v1665_v46 = vand.u32 %v2296_v57, %v2482_v5  ;;  %v2297_v10 = vld [vmem:[#allocation5 + $0x88] ss:$52 sps:$4 sm:$0xff]  }
 0x3e5   :  { %2187 = vmatprep.subr.bf16.mxu1 %v3098_v24 }
 0x4a3   :  { %v1307_v34 = vpop.f32.mrf.mxu1 }
 0x4a4   :  { %v1308_v39 = vadd.f32 %v2050_v17, %v1307_v34  ;;  %v2072_v34 = vld [vmem:[%s3034_s3 + $0x7] ss:$0 sm:$0xff] }
 0x4a5   :  { %v2179_v23 = vpop.f32.mrf.mxu1 }
 0x4a6   :  { %v1314_v37 = vmax.f32 %v1308_v39, 0.0 }
 0x4a7   :  { %v1310_v59 = vpop.f32.mrf.mxu1 }
 0x4a8   :  { %v1311_v38 = vadd.f32 %v2050_v17, %v1310_v59  ;;  %v2298_v17 = vld [vmem:[#allocation5 + $0x20] ss:$52 sps:$4 sm:$0xff]  }
 0x4a9   :  { %v2180_v49 = vpop.f32.mrf.mxu1 }
 0x4aa   :  { %v1315_v42 = vmax.f32 %v1311_v38, 0.0 }
 0x4ac   :  { %v1318_v41 = vpack.c.bf16 %v1315_v42, %v1314_v37 }
 0x4ae   :  { %2184 = vmatmul.mubr.msk.bf16.vlgmr.msra.gmra.mxu1 %vm1325_vm6, %v1318_v41 }
 0x4af   :  { %2189 = vmatprep.mubr.msk.bf16.mxu1 %vm2437_vm2, %v3098_v24  ;;  %2188 = vmatpush3.bf16.msra.mxu1 %v1401_v44  ;;  %v1735_v44 = vsel %vm1399_vm7, 4294967295, %v3125_v20 }
 0x4b0   :  { %2209 = vmatprep.subr.bf16.mxu1 %v3098_v24  ;;  %v1736_v16 = vsel %vm1734_vm8, %v1735_v44, 0 }
 0x4b1   :  { %v1738_v45 = vand.u32 %v2299_v36, %v1736_v16 }
 0x56e   :  { %v1367_v28 = vpop.f32.mrf.mxu1 }
 0x56f   :  { %v1368_v40 = vadd.f32 %v2058_v60, %v1367_v28 }
 0x570   :  { %v2185_v31 = vpop.f32.mrf.mxu1 }
 0x571   :  { %v2060_v18 = vmul.f32 -1.442695, %v1368_v40 }
 0x572   :  { %v1370_v1 = vpop.f32.mrf.mxu1 }
 0x573   :  { %2345 = vpow2.f32 %v2060_v18  ;;  %v1371_v50 = vadd.f32 %v2058_v60, %v1370_v1 }
 0x574   :  { %v2186_v63 = vpop.f32.mrf.mxu1 }
 0x575   :  { %v2061_v21 = vmul.f32 -1.442695, %v1371_v50 }
 0x577   :  { %2347 = vpow2.f32 %v2061_v21  ;;  %v2301_v21 = vld [vmem:[#allocation5 + $0x90] ss:$0 sps:$4 sm:$0xff]  }
 0x580   :  { %v2346_v12 = vpop.eup %2345 }
 0x581   :  { %v1380_v22 = vadd.f32 1.0, %v2346_v12  ;;  %v1807_v12 = vand.u32 %v2301_v21, %v1736_v16 }
 0x583   :  { %2349 = vrcp.f32 %v1380_v22  ;;  %v2302_v22 = vld [vmem:[#allocation5 + $0x28] ss:$52 sps:$4 sm:$0xff]  }
 0x584   :  { %v2348_v15 = vpop.eup %2347 }
 0x585   :  { %v1381_v48 = vadd.f32 1.0, %v2348_v15  ;;  %v2082_v15 = vld [vmem:[%s3034_s3 + $0x9] ss:$0 sm:$0xff] }
 0x587   :  { %2351 = vrcp.f32 %v1381_v48 }
 0x590   :  { %v2350_v3 = vpop.eup %2349 }
 0x594   :  { %v2352_v11 = vpop.eup %2351 }
 0x595   :  { %v1388_v14 = vpack.c.bf16 %v2352_v11, %v2350_v3 }
 0x597   :  { %2190 = vmatmul.mubr.msk.bf16.vlgmr.msra.gmra.mxu1 %vm1395_vm0, %v1388_v14 }
 0x598   :  { %2215 = vmatprep.mubr.msk.bf16.mxu1 %vm2437_vm2, %v3098_v24  ;;  %2210 = vmatpush3.bf16.msra.mxu1 %v1585_v35 }
 0x599   :  { %2211 = vmatprep.subr.bf16.mxu1 %v3098_v24 }
 0x59c   :  { %2212 = vmatpush3.bf16.msra.mxu1 %v2294_v13 }
 0x59d   :  { %2213 = vmatprep.subr.bf16.mxu1 %v3098_v24 }
 0x5a0   :  { %2214 = vmatpush3.bf16.msra.mxu1 %v2295_v33 }
 0x5a1   :  { %2219 = vmatprep.subr.bf16.mxu1 %v3098_v24 }
 0x657   :  { %v1437_v55 = vpop.f32.mrf.mxu1 }
 0x658   :  { %v1438_v51 = vadd.f32 %v2062_v6, %v1437_v55 }
 0x659   :  { %v2191_v9 = vpop.f32.mrf.mxu1 }
 0x65a   :  { %v1444_v53 = vmul.f32 %v1438_v51, %v2937_v61 }
 0x65b   :  { %v1440_v54 = vpop.f32.mrf.mxu1 }
 0x65c   :  { %v1441_v32 = vadd.f32 %v2062_v6, %v1440_v54  ;;  %v2303_v54 = vld [vmem:[#allocation5 + $0x2c] ss:$52 sps:$4 sm:$0x3f]  }
 0x65d   :  { %v2192_v27 = vpop.f32.mrf.mxu1 }
 0x65e   :  { %v1445_v26 = vmul.f32 %v1441_v32, %v2940_v56  ;;  %v1873_v32 = vsel %vm1871_vm9, 4294967295, %v3125_v20 }
 0x65f   :  { %v1874_v27 = vsel %vm1872_vm10, %v1873_v32, 0 }
 0x660   :  { %v1459_v58 = vpack.c.bf16 %v1445_v26, %v1444_v53  ;;  %v1876_v53 = vand.u32 %v2303_v54, %v1874_v27  ;;  %v2086_v26 = vld [vmem:[%s3034_s3 + $0xa] ss:$0 sm:$0xff] }
 0x662   :  { %2206 = vmatmul.mubr.msk.bf16.vlgmr.msra.gmra.mxu0 %vm1266_vm4, %v1459_v58 }
 0x663   :  { %2233 = vmatprep.mubr.msk.bf16.mxu0 %vm2437_vm2, %v3098_v24  ;;  %2230 = vmatpush3.bf16.msra.mxu0 %v1738_v45 }
 0x664   :  { %2231 = vmatprep.subr.bf16.mxu0 %v3098_v24 }
 0x667   :  { %2232 = vmatpush3.bf16.msra.mxu0 %v2300_v2 }
 0x668   :  { %2237 = vmatprep.subr.bf16.mxu0 %v3098_v24 }
 0x722   :  { %v1541_v47 = vpop.f32.mrf.mxu0 }
 0x723   :  { %v1542_v29 = vadd.f32 %v2064_v62, %v1541_v47 }
 0x724   :  { %v2207_v43 = vpop.f32.mrf.mxu0 }
 0x725   :  { %v1548_v30 = vmax.f32 %v1542_v29, 0.0  ;;  %v2304_v29 = vld [vmem:[#allocation5 + $0x30] ss:$52 sps:$4 sm:$0x3f]  }
 0x726   :  { %v1544_v52 = vpop.f32.mrf.mxu0 }
 0x727   :  { %v1545_v19 = vadd.f32 %v2064_v62, %v1544_v52  ;;  %v1940_v52 = vand.u32 %v2304_v29, %v1874_v27 }
 0x728   :  { %v2208_v7 = vpop.f32.mrf.mxu0 }
 0x729   :  { %v1549_v61 = vmax.f32 %v1545_v19, 0.0  ;;  %v2090_v19 = vld [vmem:[%s3034_s3 + $0xb] ss:$0 sm:$0xff] }
 0x72b   :  { %v1557_v56 = vpack.c.bf16 %v1549_v61, %v1548_v30 }
 0x72d   :  { %2216 = vmatmul.mubr.msk.bf16.vlgmr.msra.gmra.mxu1 %vm186_vm3, %v1557_v56 }
 0x72e   :  { %2225 = vmatprep.mubr.msk.bf16.mxu1 %vm2437_vm2, %v3098_v24  ;;  %2220 = vmatpush3.bf16.msra.mxu1 %v1665_v46 }
 0x72f   :  { %2221 = vmatprep.subr.bf16.mxu1 %v3098_v24 }
 0x732   :  { %2222 = vmatpush3.bf16.msra.mxu1 %v2297_v10 }
 0x733   :  { %2223 = vmatprep.subr.bf16.mxu1 %v3098_v24 }
 0x736   :  { %2224 = vmatpush3.bf16.msra.mxu1 %v2298_v17 }
 0x737   :  { %2245 = vmatprep.subr.bf16.mxu1 %v3098_v24 }
 0x7ed   :  { %v1621_v23 = vpop.f32.mrf.mxu1 }
 0x7ee   :  { %v1622_v59 = vadd.f32 %v2072_v34, %v1621_v23  ;;  %v2093_v23 = vld [vmem:[%s3034_s3 + $0xc] ss:$0 sm:$0xff]  ;;  %s2438_s3 = smov [#allocation7]  }
 0x7ef   :  { %v2217_v39 = vpop.f32.mrf.mxu1  ;;  %s2008_s0 = sshll.u32 %s2438_s3, 4  ;;  %s2009_s0 = int_to_ptr.vmem [resolvable:$true] %s2008_s0 }
 0x7f0   :  { %v1628_v37 = vmax.f32 %v1622_v59, 0.0  ;;  %s2401_s29 = scalar_lea.vmem %s2009_s0, 256  ;;  %p2406_p11 = scmp.lt.s32.totalorder %s2009_s0, %s2009_s0 }
 0x7f1   :  { %v1624_v38 = vpop.f32.mrf.mxu1  ;;  %p2402_p10 = scmp.ne.s32.totalorder %s2009_s0, %s2401_s29  ;;  %p2407_p12 = scmp.lt.s32.totalorder %s2401_s29, %s2401_s29 }
 0x7f2   :  { %v1625_v5 = vadd.f32 %v2072_v34, %v1624_v38 }
 0x7f3   :  { %v2218_v49 = vpop.f32.mrf.mxu1  ;;  %p2408_p13 = por %p2407_p12, %p2406_p11 }
 0x7f4   :  { %v1629_v42 = vmax.f32 %v1625_v5, 0.0 }
 0x7f5   :  { %p2409_p0 = pnand %p2408_p13, %p2402_p10 }
 0x7f6   :  { %v1637_v41 = vpack.c.bf16 %v1629_v42, %v1628_v37 }
 0x7f8   :  { %2226 = vmatmul.mubr.msk.bf16.vlgmr.msra.gmra.mxu1 %vm186_vm3, %v1637_v41  ;;  %vm1730_vm3 = vcmask 187392  }
 0x7f9   :  { %2247 = vmatprep.mubr.msk.bf16.mxu1 %vm2437_vm2, %v3098_v24  ;;  %2246 = vmatpush3.bf16.msra.mxu1 %v1876_v53 }
 0x8b8   :  { %v1701_v25 = vpop.f32.mrf.mxu1 }
 0x8b9   :  { %v1702_v28 = vadd.f32 %v2077_v4, %v1701_v25 }
 0x8ba   :  { %v2227_v60 = vpop.f32.mrf.mxu1 }
 0x8bb   :  { %v1708_v1 = vmax.f32 %v1702_v28, 0.0 }
 0x8bc   :  { %v1704_v40 = vpop.f32.mrf.mxu1 }
 0x8bd   :  { %v1705_v31 = vadd.f32 %v2077_v4, %v1704_v40 }
 0x8be   :  { %v2228_v18 = vpop.f32.mrf.mxu1 }
 0x8bf   :  { %v1709_v50 = vmax.f32 %v1705_v31, 0.0 }
 0x8c1   :  { %v1714_v63 = vpack.c.bf16 %v1709_v50, %v1708_v1 }
 0x8c3   :  { %2234 = vmatmul.mubr.msk.bf16.vlgmr.msra.gmra.mxu0 %vm1730_vm3, %v1714_v63 }
 0x8c4   :  { %2241 = vmatprep.mubr.msk.bf16.mxu0 %vm2437_vm2, %v3098_v24  ;;  %2238 = vmatpush3.bf16.msra.mxu0 %v1807_v12 }
 0x8c5   :  { %2239 = vmatprep.subr.bf16.mxu0 %v3098_v24 }
 0x8c8   :  { %2240 = vmatpush3.bf16.msra.mxu0 %v2302_v22 }
 0x8c9   :  { %2251 = vmatprep.subr.bf16.mxu0 %v3098_v24 }
 0x983   :  { %v1774_v48 = vpop.f32.mrf.mxu0 }
 0x984   :  { %v1775_v11 = vadd.f32 %v2082_v15, %v1774_v48 }
 0x985   :  { %v2235_v3 = vpop.f32.mrf.mxu0 }
 0x986   :  { %v1781_v55 = vmax.f32 %v1775_v11, 0.0 }
 0x987   :  { %v1777_v14 = vpop.f32.mrf.mxu0 }
 0x988   :  { %v1778_v0 = vadd.f32 %v2082_v15, %v1777_v14 }
 0x989   :  { %v2236_v6 = vpop.f32.mrf.mxu0 }
 0x98a   :  { %v1782_v9 = vmax.f32 %v1778_v0, 0.0 }
 0x98c   :  { %v1787_v51 = vpack.c.bf16 %v1782_v9, %v1781_v55 }
 0x98e   :  { %2242 = vmatmul.mubr.msk.bf16.vlgmr.msra.gmra.mxu0 %vm1730_vm3, %v1787_v51 }
 0x98f   :  { %2253 = vmatprep.mubr.msk.bf16.mxu0 %vm2437_vm2, %v3098_v24  ;;  %2252 = vmatpush3.bf16.msra.mxu0 %v1940_v52 }
 0xa4e   :  { %v1843_v58 = vpop.f32.mrf.mxu0 }
 0xa4f   :  { %v1844_v35 = vadd.f32 %v2086_v26, %v1843_v58 }
 0xa50   :  { %v2243_v8 = vpop.f32.mrf.mxu0 }
 0xa51   :  { %v1850_v47 = vmax.f32 %v1844_v35, 0.0 }
 0xa52   :  { %v1846_v13 = vpop.f32.mrf.mxu0 }
 0xa53   :  { %v1847_v33 = vadd.f32 %v2086_v26, %v1846_v13 }
 0xa54   :  { %v2244_v62 = vpop.f32.mrf.mxu0 }
 0xa55   :  { %v1851_v24 = vmax.f32 %v1847_v33, 0.0 }
 0xa57   :  { %v1855_v43 = vpack.c.bf16 %v1851_v24, %v1850_v47 }
 0xa59   :  { %2248 = vmatmul.mubr.msk.bf16.vlgmr.msra.gmra.mxu1 %vm1867_vm11, %v1855_v43 }
 0xb19   :  { %v1912_v7 = vpop.f32.mrf.mxu1 }
 0xb1a   :  { %v1913_v61 = vadd.f32 %v2090_v19, %v1912_v7 }
 0xb1b   :  { %v2249_v30 = vpop.f32.mrf.mxu1 }
 0xb1c   :  { %v1919_v10 = vmax.f32 %v1913_v61, 0.0 }
 0xb1d   :  { %v1915_v56 = vpop.f32.mrf.mxu1 }
 0xb1e   :  { %v1916_v57 = vadd.f32 %v2090_v19, %v1915_v56 }
 0xb1f   :  { %v2250_v46 = vpop.f32.mrf.mxu1 }
 0xb20   :  { %v1920_v17 = vmax.f32 %v1916_v57, 0.0 }
 0xb22   :  { %v1924_v34 = vpack.c.bf16 %v1920_v17, %v1919_v10 }
 0xb24   :  { %2254 = vmatmul.mubr.msk.bf16.vlgmr.msra.gmra.mxu0 %vm1867_vm11, %v1924_v34 }
 0xbe4   :  { %v1976_v39 = vpop.f32.mrf.mxu0 }
 0xbe5   :  { %v1977_v59 = vadd.f32 %v2093_v23, %v1976_v39 }
 0xbe6   :  { %v2255_v38 = vpop.f32.mrf.mxu0 }
 0xbe7   :  { %1983 = vmax.xlane.f32.xlu0 %v1977_v59 }
 0xbe8   :  { %v1979_v5 = vpop.f32.mrf.mxu0 }
 0xbe9   :  { %v1980_v49 = vadd.f32 %v2093_v23, %v1979_v5 }
 0xbea   :  { %v2256_v37 = vpop.f32.mrf.mxu0 }
 0xbeb   :  { %1985 = vmax.xlane.f32.xlu1 %v1980_v49 }
 0xc70   :  { %v1984_v42 = vpop.xlane.xlu0 %1983 }
 0xc71   :  { %v1987_v41 = vsub.f32 %v1977_v59, %v1984_v42 }
 0xc73   :  { %v1989_v20 = vmul.f32 1.442695, %v1987_v41 }
 0xc74   :  { %v1986_v44 = vpop.xlane.xlu1 %1985 }
 0xc75   :  { %2353 = vpow2.f32 %v1989_v20  ;;  %v1988_v16 = vsub.f32 %v1980_v49, %v1986_v44 }
 0xc77   :  { %v1991_v36 = vmul.f32 1.442695, %v1988_v16 }
 0xc79   :  { %2355 = vpow2.f32 %v1991_v36 }
 0xc82   :  { %v2354_v45 = vpop.eup %2353 }
 0xc83   :  { %1993 = vadd.xlane.f32.xlu0 %v2354_v45 }
 0xc86   :  { %v2356_v2 = vpop.eup %2355 }
 0xc87   :  { %1995 = vadd.xlane.f32.xlu0 %v2356_v2 }
 0xd0c   :  { %v1994_v4 = vpop.xlane.xlu0 %1993 }
 0xd0d   :  { %2357 = vrcp.f32 %v1994_v4 }
 0xd10   :  { %v1996_v25 = vpop.xlane.xlu0 %1995 }
 0xd11   :  { %2359 = vrcp.f32 %v1996_v25 }
 0xd1a   :  { %v2358_v60 = vpop.eup %2357 }
 0xd1b   :  { %v1998_v28 = vmul.f32 %v2358_v60, %v2354_v45 }
 0xd1d   :  { %2001 = vst [vmem:[#allocation7] sm:$0xff] %v1998_v28 }
 0xd1e   :  { %v2360_v40 = vpop.eup %2359 }
 0xd1f   :  { %v2000_v31 = vmul.f32 %v2360_v40, %v2356_v2 }
 0xd21   :  { %2002 = vst [vmem:[#allocation7 + $0x8] sm:$0xff] %v2000_v31 }
 0xd22   :  { %2412 = shalt.err (!%p2409_p0)
}
 0xd23   :  { %2014 = dma.vmem_to_hbm [thread:$0]  %s2009_s0, 256, %s3035_s4, [#allocation4], %s2428_s18, %s2428_s18, %s2429_s19  }
 0xd24   :  { %2425 = dma.done.wait [#allocation4], 256  }
 0xd25   :  { %2426 = vsyncadd [#allocation4], 4294967040 }
 0xd26   :  { %2018 = vsyncpa [#allocation3], 1 }
 0xd27   :  { %2019 = vsyncpa [#allocation6], 1 }
 0xd28   :  { %2020 = vsyncpa [#allocation4], 1 }

</bundles_post_ra>
